<compile_context>
chip_gen: v7x
topology: tpu7x:2x2x1
jax: 0.10.0
libtpu: 0.0.40
codegen_flags: <defaults>
</compile_context>

<pallas_src>
import functools

import jax
import jax.numpy as jnp
from jax.experimental import pallas as pl
from jax.experimental.pallas import tpu as pltpu


def _edge_conv_kernel(p_ref, xt_ref, idx_ref, wcd_ref, b_ref, o_ref, *, lg):
    # p_ref  : (1, C_out, N)     Wd @ x for the whole batch (gather source, resident per b)
    # xt_ref : (1, C_in, Tn)     features of the current target-node tile
    # idx_ref: (1, 1, 1, L*Tn)   neighbor indices, lane position = l*Tn + node_in_tile
    # wcd_ref: (C_out, C_in)     Wc - Wd
    # b_ref  : (C_out, 1)        bias
    # o_ref  : (1, C_out, Tn)    output tile (lane = node -> unmasked stores)
    p = p_ref[0]                                  # [C_out, N] f32
    x_tile = xt_ref[0]                            # [C_in, Tn]
    idx2d = idx_ref[0, 0]                         # [1, L*Tn] int32
    _, N = p.shape
    Tn = o_ref.shape[2]
    L = idx2d.shape[1] // Tn

    # center_i = (Wc - Wd) @ x_i + b  for the tile nodes          -> [C_out, Tn]
    center = jnp.dot(wcd_ref[...], x_tile,
                     preferred_element_type=jnp.float32) + b_ref[...]

    # bf16 gather source (native MXU rate; one-hot selection itself is exact).
    p_bf = p.astype(jnp.bfloat16)
    # [N, 1] iota column; broadcast happens inside the compare (no [N, Tn] buffer).
    row_iota = jax.lax.broadcasted_iota(jnp.int32, (N, 1), 0)

    # Fused gather: chunks of `lg` neighbor slots per wide one-hot matmul, then a
    # running VALU max over the static lane slices of each chunk result.
    agg = None
    for l0 in range(0, L, lg):
        cur = min(lg, L - l0)
        idx_chunk = idx2d[:, l0 * Tn:(l0 + cur) * Tn]                 # [1, cur*Tn]
        onehot = (row_iota == idx_chunk).astype(jnp.bfloat16)         # [N, cur*Tn]
        wide = jnp.dot(p_bf, onehot,
                       preferred_element_type=jnp.float32)            # [C_out, cur*Tn]
        for l in range(cur):
            sl = wide[:, l * Tn:(l + 1) * Tn]
            agg = sl if agg is None else jnp.maximum(agg, sl)

    # ReLU once (exact: ReLU is monotone, the x_i terms are constant over j).
    o_ref[0] = jnp.maximum(center + agg, 0.0).astype(o_ref.dtype)


def graph_conv2d_edge(x_nchw, edge_index, wc, wd, bias, *, node_tile=512):
    """EdgeConv forward.

    x_nchw    : [B, C_in, N, 1] float
    edge_index: [2, B, N, L] int  (row 0 = neighbor idx, row 1 = center idx)
    wc, wd    : [C_out, C_in]     (center / difference halves of Linear(2*C_in, C_out))
    bias      : [C_out]
    returns   : [B, C_out, N, 1]
    """
    B, C_in, N, _ = x_nchw.shape
    C_out = wc.shape[0]
    L = edge_index.shape[-1]

    # Channel-major [B, C_in, N]: node dim lands on the lane axis, no transposes of x/out.
    x_bcn = x_nchw[..., 0].astype(jnp.float32)
    wd_f = wd.astype(jnp.float32)
    wcd = (wc - wd).astype(jnp.float32)                  # [C_out, C_in]
    b2 = bias.reshape(C_out, 1).astype(jnp.float32)      # [C_out, 1]

    # Hoisted projection: p = Wd @ x, once per batch as a single XLA GEMM. The kernel only
    # reads it (resident per batch) instead of recomputing it for every node tile.
    p = jnp.einsum('oc,bcn->bon', wd_f, x_bcn)           # [B, C_out, N] f32

    # Node tile: multiple of 128 dividing N, else fall back to the full node dim.
    # TODO(synk): non-128-aligned N falls back to a single whole-graph tile ([N, L*N]
    # one-hot temp) — pad N to a multiple of 128 upstream for large graphs.
    if N % 128 == 0 and node_tile % 128 == 0 and N % node_tile == 0:
        Tn = node_tile
    else:
        Tn = N
    n_tiles = N // Tn

    # Neighbor indices rearranged in the wrapper to [B, n_tiles, 1, L*Tn] so the fused
    # one-hot compare needs no in-kernel sublane->lane reshape: lane pos = l*Tn + node.
    nbr = jnp.transpose(edge_index[0].astype(jnp.int32), (0, 2, 1))   # [B, L, N]
    nbr = nbr.reshape(B, L, n_tiles, Tn).transpose(0, 2, 1, 3)        # [B, n_tiles, L, Tn]
    nbr = nbr.reshape(B, n_tiles, 1, L * Tn)

    # Chunk the L neighbor slots so the transient [N, LG*Tn] bf16 one-hot stays <= ~4 MiB.
    LG = int(max(1, min(L, (4 * 1024 * 1024) // max(1, N * Tn * 2))))

    # VMEM budget derived from the working set (48 MiB cap also fits v7x's 64 MiB VMEM).
    est = (
        2 * C_out * N * 4            # p block (double-buffered, resident per batch)
        + C_out * N * 2              # p cast to bf16
        + 2 * 2 * C_in * Tn * 4      # x tile (double-buffered)
        + 2 * L * Tn * 4             # idx tile (double-buffered)
        + 2 * C_out * Tn * 4         # out tile (double-buffered)
        + C_out * C_in * 4 + C_out * 4
        + N * LG * Tn * 2            # one-hot temp (bf16)
        + C_out * LG * Tn * 4        # wide gather result
    )
    vmem_limit = int(min(48 * 1024 * 1024, max(16 * 1024 * 1024, 2 * est)))

    out = pl.pallas_call(
        functools.partial(_edge_conv_kernel, lg=LG),
        out_shape=jax.ShapeDtypeStruct((B, C_out, N), jnp.float32),
        grid=(B, n_tiles),
        in_specs=[
            pl.BlockSpec((1, C_out, N),       lambda b, t: (b, 0, 0)),     # p (resident per batch)
            pl.BlockSpec((1, C_in, Tn),       lambda b, t: (b, 0, t)),     # x tile (center term)
            pl.BlockSpec((1, 1, 1, L * Tn),   lambda b, t: (b, t, 0, 0)),  # neighbor idx tile
            pl.BlockSpec((C_out, C_in),       lambda b, t: (0, 0)),        # Wc - Wd (resident)
            pl.BlockSpec((C_out, 1),          lambda b, t: (0, 0)),        # bias    (resident)
        ],
        out_specs=pl.BlockSpec((1, C_out, Tn), lambda b, t: (b, 0, t)),
        compiler_params=pltpu.CompilerParams(
            dimension_semantics=("parallel", "parallel"),
            vmem_limit_bytes=vmem_limit,
        ),
    )(p, x_bcn, nbr, wcd, b2)

    return out[..., None]                                # [B, C_out, N, 1]


def _reference(x_nchw, edge_index, wc, wd, bias):
    """Pure-JAX reference of the same EdgeConv forward (ReLU per message, then max)."""
    x = jnp.transpose(x_nchw[..., 0], (0, 2, 1))         # [B, N, C_in]
    nbr = edge_index[0].astype(jnp.int32)                # [B, N, L]
    xj = jax.vmap(lambda xb, ib: xb[ib])(x, nbr)         # [B, N, L, C_in]
    center = x @ wc.T + bias                             # [B, N, C_out]
    neigh = (xj - x[:, :, None, :]) @ wd.T               # [B, N, L, C_out]
    msg = jax.nn.relu(center[:, :, None, :] + neigh)
    out = jnp.max(msg, axis=2)                           # [B, N, C_out]
    return jnp.transpose(out, (0, 2, 1))[..., None]      # [B, C_out, N, 1]


if __name__ == "__main__":
    B, C_in, N, L, C_out = 2, 4, 256, 8, 16

    key = jax.random.PRNGKey(0)
    kx, ki, kw, kb = jax.random.split(key, 4)

    # x: [B, C_in, N, 1]  (PyTorch NCHW-style node features)
    x = jax.random.normal(kx, (B, C_in, N, 1), dtype=jnp.float32)

    # edge_index: [2, B, N, L] -- row 0 = neighbor indices, row 1 = center indices
    nbr_idx = jax.random.randint(ki, (B, N, L), 0, N, dtype=jnp.int32)
    ctr_idx = jnp.broadcast_to(jnp.arange(N, dtype=jnp.int32)[None, :, None], (B, N, L))
    edge_index = jnp.stack([nbr_idx, ctr_idx], axis=0)

    # Linear(2*C_in, C_out) weight split into W_center (on x_i) and W_diff (on x_j - x_i).
    W = 0.1 * jax.random.normal(kw, (C_out, 2 * C_in), dtype=jnp.float32)
    bias = 0.1 * jax.random.normal(kb, (C_out,), dtype=jnp.float32)
    wc = W[:, :C_in]          # [C_out, C_in]
    wd = W[:, C_in:]          # [C_out, C_in]

    # node_tile=128 so the node grid axis is actually exercised at this toy N.
    out = graph_conv2d_edge(x, edge_index, wc, wd, bias, node_tile=128)
    out = jax.block_until_ready(out)

    ref = _reference(x, edge_index, wc, wd, bias)
    assert out.shape == (B, C_out, N, 1)
    # Tolerance loosened vs pure-f32: the gather matmul runs p in bf16 (~1e-3 abs here).
    assert jnp.allclose(out, ref, atol=1e-2, rtol=1e-2), float(jnp.max(jnp.abs(out - ref)))

    print("KERNEL_OK")
</pallas_src>

<mosaic_0001>
module attributes {stable_mosaic.version = 11 : i64} {
  func.func @_edge_conv_kernel(%arg0: i32, %arg1: i32, %arg2: memref<1x16x256xf32, #tpu.memory_space<vmem>>, %arg3: memref<1x4x128xf32, #tpu.memory_space<vmem>>, %arg4: memref<1x1x1x1024xi32, #tpu.memory_space<vmem>>, %arg5: memref<16x4xf32, #tpu.memory_space<vmem>>, %arg6: memref<16x1xf32, #tpu.memory_space<vmem>>, %arg7: memref<1x16x128xf32, #tpu.memory_space<vmem>>) attributes {dimension_semantics = [#tpu.dimension_semantics<parallel>, #tpu.dimension_semantics<parallel>], iteration_bounds = array<i64: 2, 2>, scalar_prefetch = 0 : i64, scratch_operands = 0 : i64, tpu.core_type = #tpu.core_type<tc>, window_params = [{transform_indices = @transform_0, window_bounds = array<i64: 1, 16, 256>}, {transform_indices = @transform_1, window_bounds = array<i64: 1, 4, 128>}, {transform_indices = @transform_2, window_bounds = array<i64: 1, 1, 1, 1024>}, {pipeline_mode = #tpu.pipeline_mode<synchronous>, transform_indices = @transform_3, window_bounds = array<i64: 16, 4>}, {pipeline_mode = #tpu.pipeline_mode<synchronous>, transform_indices = @transform_4, window_bounds = array<i64: 16, 1>}, {transform_indices = @transform_5, window_bounds = array<i64: 1, 16, 128>}]} {
    %c0 = arith.constant 0 : index
    %c0_0 = arith.constant 0 : index
    %c0_1 = arith.constant 0 : index
    %0 = vector.load %arg2[%c0, %c0_0, %c0_1] : memref<1x16x256xf32, #tpu.memory_space<vmem>>, vector<1x16x256xf32>
    %1 = vector.shape_cast %0 : vector<1x16x256xf32> to vector<16x256xf32>
    %c0_2 = arith.constant 0 : index
    %c0_3 = arith.constant 0 : index
    %c0_4 = arith.constant 0 : index
    %2 = vector.load %arg3[%c0_2, %c0_3, %c0_4] : memref<1x4x128xf32, #tpu.memory_space<vmem>>, vector<1x4x128xf32>
    %3 = vector.shape_cast %2 : vector<1x4x128xf32> to vector<4x128xf32>
    %c0_5 = arith.constant 0 : index
    %c0_6 = arith.constant 0 : index
    %c0_7 = arith.constant 0 : index
    %c0_8 = arith.constant 0 : index
    %4 = vector.load %arg4[%c0_5, %c0_6, %c0_7, %c0_8] : memref<1x1x1x1024xi32, #tpu.memory_space<vmem>>, vector<1x1x1x1024xi32>
    %5 = vector.shape_cast %4 : vector<1x1x1x1024xi32> to vector<1x1024xi32>
    %c0_9 = arith.constant 0 : index
    %c0_10 = arith.constant 0 : index
    %6 = vector.load %arg5[%c0_9, %c0_10] : memref<16x4xf32, #tpu.memory_space<vmem>>, vector<16x4xf32>
    %cst = arith.constant dense<0.000000e+00> : vector<16x128xf32>
    %7 = tpu.matmul %6, %3, %cst {dimension_numbers = #tpu.dot_dimension_numbers<[1], [0], [0], [1], [0, 0, 1, 1], [], []>} : vector<16x4xf32>, vector<4x128xf32>, vector<16x128xf32> -> vector<16x128xf32>
    %c0_11 = arith.constant 0 : index
    %c0_12 = arith.constant 0 : index
    %8 = vector.load %arg6[%c0_11, %c0_12] : memref<16x1xf32, #tpu.memory_space<vmem>>, vector<16x1xf32>
    %9 = vector.broadcast %8 : vector<16x1xf32> to vector<16x128xf32>
    %10 = arith.addf %7, %9 : vector<16x128xf32>
    %11 = arith.truncf %1 : vector<16x256xf32> to vector<16x256xbf16>
    %12 = tpu.iota {dimensions = array<i32: 0>} : vector<256x1xi32>
    %13 = vector.broadcast %12 : vector<256x1xi32> to vector<256x1024xi32>
    %14 = vector.broadcast %5 : vector<1x1024xi32> to vector<256x1024xi32>
    %15 = arith.cmpi eq, %13, %14 : vector<256x1024xi32>
    %16 = arith.extui %15 : vector<256x1024xi1> to vector<256x1024xi32>
    %17 = arith.sitofp %16 : vector<256x1024xi32> to vector<256x1024xf32>
    %18 = arith.truncf %17 : vector<256x1024xf32> to vector<256x1024xbf16>
    %cst_13 = arith.constant dense<0.000000e+00> : vector<16x1024xf32>
    %19 = tpu.matmul %11, %18, %cst_13 {dimension_numbers = #tpu.dot_dimension_numbers<[1], [0], [0], [1], [0, 0, 1, 1], [], []>} : vector<16x256xbf16>, vector<256x1024xbf16>, vector<16x1024xf32> -> vector<16x1024xf32>
    %20 = vector.extract_strided_slice %19 {offsets = [0, 0], sizes = [16, 128], strides = [1, 1]} : vector<16x1024xf32> to vector<16x128xf32>
    %21 = vector.extract_strided_slice %19 {offsets = [0, 128], sizes = [16, 128], strides = [1, 1]} : vector<16x1024xf32> to vector<16x128xf32>
    %22 = arith.maximumf %20, %21 : vector<16x128xf32>
    %23 = vector.extract_strided_slice %19 {offsets = [0, 256], sizes = [16, 128], strides = [1, 1]} : vector<16x1024xf32> to vector<16x128xf32>
    %24 = arith.maximumf %22, %23 : vector<16x128xf32>
    %25 = vector.extract_strided_slice %19 {offsets = [0, 384], sizes = [16, 128], strides = [1, 1]} : vector<16x1024xf32> to vector<16x128xf32>
    %26 = arith.maximumf %24, %25 : vector<16x128xf32>
    %27 = vector.extract_strided_slice %19 {offsets = [0, 512], sizes = [16, 128], strides = [1, 1]} : vector<16x1024xf32> to vector<16x128xf32>
    %28 = arith.maximumf %26, %27 : vector<16x128xf32>
    %29 = vector.extract_strided_slice %19 {offsets = [0, 640], sizes = [16, 128], strides = [1, 1]} : vector<16x1024xf32> to vector<16x128xf32>
    %30 = arith.maximumf %28, %29 : vector<16x128xf32>
    %31 = vector.extract_strided_slice %19 {offsets = [0, 768], sizes = [16, 128], strides = [1, 1]} : vector<16x1024xf32> to vector<16x128xf32>
    %32 = arith.maximumf %30, %31 : vector<16x128xf32>
    %33 = vector.extract_strided_slice %19 {offsets = [0, 896], sizes = [16, 128], strides = [1, 1]} : vector<16x1024xf32> to vector<16x128xf32>
    %34 = arith.maximumf %32, %33 : vector<16x128xf32>
    %35 = arith.addf %10, %34 : vector<16x128xf32>
    %cst_14 = arith.constant 0.000000e+00 : f32
    %36 = vector.broadcast %cst_14 : f32 to vector<16x128xf32>
    %37 = arith.maximumf %35, %36 : vector<16x128xf32>
    %c0_15 = arith.constant 0 : index
    %c0_16 = arith.constant 0 : index
    %c0_17 = arith.constant 0 : index
    %38 = vector.load %arg7[%c0_15, %c0_16, %c0_17] : memref<1x16x128xf32, #tpu.memory_space<vmem>>, vector<1x16x128xf32>
    %39 = vector.shape_cast %38 : vector<1x16x128xf32> to vector<16x128xf32>
    %40 = vector.shape_cast %37 : vector<16x128xf32> to vector<1x16x128xf32>
    tpu.vector_store %arg7[%c0_15, %c0_16, %c0_17], %40 {strides = array<i32>} : memref<1x16x128xf32, #tpu.memory_space<vmem>>, vector<1x16x128xf32>,
    return
  }
  func.func @transform_0(%arg0: i32, %arg1: i32) -> (i32, i32, i32) {
    %c0_i32 = arith.constant 0 : i32
    %c0_i32_0 = arith.constant 0 : i32
    %c0_i32_1 = arith.constant 0 : i32
    return %arg0, %c0_i32, %c0_i32_0 : i32, i32, i32
  }
  func.func @transform_1(%arg0: i32, %arg1: i32) -> (i32, i32, i32) {
    %c0_i32 = arith.constant 0 : i32
    %c0_i32_0 = arith.constant 0 : i32
    return %arg0, %c0_i32, %arg1 : i32, i32, i32
  }
  func.func @transform_2(%arg0: i32, %arg1: i32) -> (i32, i32, i32, i32) {
    %c0_i32 = arith.constant 0 : i32
    %c0_i32_0 = arith.constant 0 : i32
    %c0_i32_1 = arith.constant 0 : i32
    return %arg0, %arg1, %c0_i32, %c0_i32_0 : i32, i32, i32, i32
  }
  func.func @transform_3(%arg0: i32, %arg1: i32) -> (i32, i32) {
    %c0_i32 = arith.constant 0 : i32
    %c0_i32_0 = arith.constant 0 : i32
    %c0_i32_1 = arith.constant 0 : i32
    return %c0_i32, %c0_i32_0 : i32, i32
  }
  func.func @transform_4(%arg0: i32, %arg1: i32) -> (i32, i32) {
    %c0_i32 = arith.constant 0 : i32
    %c0_i32_0 = arith.constant 0 : i32
    %c0_i32_1 = arith.constant 0 : i32
    return %c0_i32, %c0_i32_0 : i32, i32
  }
  func.func @transform_5(%arg0: i32, %arg1: i32) -> (i32, i32, i32) {
    %c0_i32 = arith.constant 0 : i32
    %c0_i32_0 = arith.constant 0 : i32
    return %arg0, %c0_i32, %arg1 : i32, i32, i32
  }
}

</mosaic_0001>

<bundles_post_ra>
// kernel: tpu_custom_call.1
= control target key start
LH: loop header
LB: loop body
LE: loop exit
PB: predicated region body
PF: predicated region fallthrough
CT: control target
= control target key end

     0   :  { %s4342_s0 = inlined_call_operand.hbm [shape: f32[2,16,256], index: 0, kind: input, shape index: {}]   ;;  %s4343_s1 = inlined_call_operand.hbm [shape: f32[2,4,256], index: 1, kind: input, shape index: {}]   ;;  %s4344_s2 = inlined_call_operand.vmem [shape: s32[2,2,1,1024], index: 2, kind: input, shape index: {}]   ;;  %s4345_s3 = inlined_call_operand.vmem [shape: f32[16,4], index: 3, kind: input, shape index: {}]   ;;  %s4346_s4 = inlined_call_operand.vmem [shape: f32[16,1], index: 4, kind: input, shape index: {}]   ;;  %s4347_s5 = inlined_call_operand.hbm [shape: f32[2,16,256], index: 5, kind: output, shape index: {}]  }
   0x1   :  { %4359 = sst [smem:[#allocation15_spill]] %s4342_s0 }
   0x2   :  { %4360 = sst [smem:[#allocation16_spill]] %s4347_s5 }
   0x3   :  { %10 = vsyncpa [#allocation3], 0 }
   0x4   :  { %12 = vsyncpa [#allocation3 + $0x1], 0 }
   0x5   :  { %13 = vsyncpa [#allocation6], 0 }
   0x6   :  { %15 = vsyncpa [#allocation6 + $0x1], 0 }
   0x7   :  { %16 = vsyncpa [#allocation4], 0 }
   0x8   :  { %18 = vsyncpa [#allocation4 + $0x1], 0  ;;  %s2622_s18 = smov 0   ;;  %s2624_s19 = smov 0  }
   0x9   :  { %s2626_s20 = smov 0   ;;  %s2628_s21 = smov 0  }
   0xa   :  { %s2630_s22 = smov 0   ;;  %s2632_s23 = smov 0  }
   0xb   :  { %s2634_s24 = smov 0   ;;  %s2636_s25 = smov 0  }
   0xc   :  { %s2638_s26 = smov 0   ;;  %s2640_s27 = smov 0  }
   0xd   :  { %s2642_s28 = smov 0  }
   0xe LB: > { %4361 = sst [smem:[#allocation11_spill]] %s2540_s18  ;;  %p50_p0 = scmp.ne.s32.totalorder %s2560_s23, %s2556_s22  ;;  %s2580_s28 = sphi %s2642_s28, %s24_s28   ;;  %s2576_s27 = sphi %s2640_s27, %s4550_s27   ;;  %s2572_s26 = sphi %s2638_s26, %s4549_s26   ;;  %s2568_s25 = sphi %s2636_s25, %s4548_s25   ;;  %s2564_s24 = sphi %s2634_s24, %s4547_s24   ;;  %s2560_s23 = sphi %s2632_s23, %s4546_s23   ;;  %s2556_s22 = sphi %s2630_s22, %s4545_s22   ;;  %s2552_s21 = sphi %s2628_s21, %s4544_s21   ;;  %s2548_s20 = sphi %s2626_s20, %s4543_s20   ;;  %s2544_s19 = sphi %s2624_s19, %s4542_s19   ;;  %s2540_s18 = sphi %s2622_s18, %s4541_s18  }
   0xf   : > { %s43_s29 = sadd.s32 1, %s2560_s23  ;;  %p4349_p1 = scmp.eq.s32.totalorder %s2580_s28, 0 }
  0x10   : > { %p4348_p2 = scmp.lt.s32.totalorder %s2580_s28, 4  ;;  %s212_s30 = sand.u32 1, %s2560_s23  }
  0x11   : > { %p52_p3 = por %p4349_p1, %p50_p0  ;;  %s1738_s6 = sshll.u32 %s212_s30, 5 }
  0x12   : > { %s2270_s7 = sshll.u32 %s2576_s27, 9  ;;  %s4362_s0 = sld [smem:[#allocation15_spill]] }
  0x13   : > { %s216_s11 = scalar_lea.vmem [#allocation2], %s1738_s6  ;;  %p2695_p4 = pnand %p4348_p2, %p52_p3 }
  0x14   : > { %s223_s12 = sshll.u32 %s216_s11, 4  ;;  %p1744_p5 = scmp.ge.s32.totalorder %s2580_s28, 1  ;;  %s2691_s12 = int_to_ptr.vmem [resolvable:$true] %s223_s12 }
  0x15   : > { %s2700_s14 = scalar_lea.sflag [#allocation3], %s212_s30  ;;  %p2396_p7 = pneg %p2695_p4 }
  0x18   : > { %s2689_s10 = scalar_lea.hbm %s4362_s0, %s2270_s7  ;;  %s2399_s6 = scalar_lea.hbm %s4362_s0, 1024 }
  0x19   : > { %s2394_s15 = scalar_lea.hbm %s2689_s10, 512  ;;  %p2400_p10 = scmp.lt.u32.totalorder %s2689_s10, %s4362_s0 }
  0x1a   : > { %p2395_p6 = scmp.ne.s32.totalorder %s2689_s10, %s2394_s15  ;;  %p2401_p11 = scmp.lt.u32.totalorder %s2399_s6, %s2394_s15 }
  0x1b   : > { %p2403_p13 = scmp.lt.u32.totalorder %s2394_s15, %s2689_s10 }
  0x1c   : > { %p2397_p8 = pnand %p2396_p7, %p2395_p6  ;;  %p2402_p12 = por %p2401_p11, %p2400_p10 }
  0x1e   : > { %p2398_p9 = pneg %p2397_p8  ;;  %p2404_p0 = por %p2403_p13, %p2402_p12 }
  0x20   : > { %p2405_p3 = pnand %p2404_p0, %p2398_p9 }
  0x22   : > { %2408 = shalt.err (!%p2405_p3)
}
  0x23   : > { %s2409_s30 = scalar_lea.vmem %s2691_s12, 512  ;;  %s2582_s9 = smov [#allocation2]  }
  0x24   : > { %p2410_p6 = scmp.ne.s32.totalorder %s2691_s12, %s2409_s30  ;;  %s2414_s11 = sshll.u32 %s2582_s9, 4  ;;  %s2415_s11 = int_to_ptr.vmem [resolvable:$false] %s2414_s11 }
  0x25   : > { %s2416_s16 = scalar_lea.vmem %s2415_s11, 1024  ;;  %p2417_p1 = scmp.lt.s32.totalorder %s2691_s12, %s2415_s11 }
  0x26   : > { %p2412_p8 = pnand %p2410_p6, %p2396_p7  ;;  %p2418_p10 = scmp.lt.s32.totalorder %s2416_s16, %s2409_s30 }
  0x28   : > { %p2413_p2 = pneg %p2412_p8  ;;  %p2419_p11 = por %p2418_p10, %p2417_p1 }
  0x2a   : > { %p2420_p12 = pnand %p2419_p11, %p2413_p2 }
  0x2c   : > { %2423 = shalt.err (!%p2420_p12)
}
  0x2d   : > { %s2583_s15 = smov 256   ;;  %s2584_s17 = smov 16  }
  0x2e   : > { %2288 = dma.hbm_to_vmem [thread:$0]  (!%p2695_p4), %s2689_s10, 512, %s2691_s12, %s2700_s14, %s2583_s15, %s2583_s15, %s2584_s17  }
  0x2f   : > { %p262_p1 = scmp.lt.s32.totalorder %s2580_s28, 5  ;;  %p56_p7 = scmp.ne.s32.totalorder %s2556_s22, %s2552_s21 }
  0x30   : > { %s1734_s7 = sadd.s32 4294967295, %s2580_s28   ;;  %s33_s8 = sadd.s32 1, %s2572_s26 }
  0x31   : > { %p2731_p2 = pnand %p1744_p5, %p262_p1  ;;  %s36_s30 = sadd.s32 1, %s2576_s27 }
  0x32   : > { %p34_p9 = scmp.ge.s32.totalorder %s33_s8, 2  ;;  %p57_p13 = scmp.eq.s32.totalorder %s1734_s7, 0 }
  0x33   : > { %s1735_s13 = sadd.s32 4294967294, %s2580_s28   ;;  %s71_s10 = sadd.s32 1, %s2548_s20 }
  0x34   : > { %s4552_s8 = smov (%p34_p9, %s33_s8), 0  ;;  %s4554_s30 = smov (!%p34_p9, %s36_s30), %s2576_s27 }
  0x35   : > { %4365 = sst [smem:[#allocation12_spill]] %s4552_s8  ;;  %p2745_p4 = por %p57_p13, %p56_p7 }
  0x36   : > { %p78_p5 = scmp.ne.s32.totalorder %s2548_s20, %s2544_s19  ;;  %p38_p0 = scmp.ge.s32.totalorder %s4554_s30, 2 }
  0x37   : > { %s4366_s12 = scalar_select %p2745_p4, 1, 0 }
  0x38   : > { %s67_s21 = ssub.s32 %s2572_s26, %s4552_s8  ;;  %p84_p3 = scmp.ne.s32.totalorder %s2544_s19, %s2540_s18 }
  0x39   : > { %p180_p6 = scmp.eq.s32.totalorder %s1734_s7, 3  ;;  %s4556_s30 = smov (%p38_p0, %s4554_s30), 0 }
  0x3a   : > { %4367 = sst [smem:[#allocation13_spill]] %s4556_s30  ;;  %p2757_p8 = por %p84_p3, %p57_p13 }
  0x3b   : > { %p2764_p10 = por %p180_p6, %p78_p5  ;;  %s40_s11 = ssub.s32 %s2576_s27, %s4556_s30 }
  0x3c   : > { %s4368_s14 = scalar_select %p2757_p8, 1, 0 }
  0x3d   : > { %s4369_s9 = scalar_select %p2764_p10, 1, 0 }
  0x3e   : > { %p186_p11 = scmp.eq.s32.totalorder %s1735_s13, 3  ;;  %p41_p12 = scmp.eq.s32.totalorder %s40_s11, 0 }
  0x3f   : > { %4370 = sst [smem:[#allocation14_spill]] %s4369_s9  ;;  %s68_s16 = sor.u32 %s67_s21, %s40_s11 }
  0x40   : > { %p69_p1 = scmp.eq.s32.totalorder %s68_s16, 0  ;;  %p2770_p7 = por %p186_p11, %p84_p3 }
  0x41   : > { %s2777_s17 = scalar_select %p41_p12, %s2560_s23, %s43_s29  }
  0x42   : > { %s4371_s15 = scalar_select %p2770_p7, 1, 0 }
  0x43   : > { %s2780_s7 = scalar_select %p69_p1, %s2548_s20, %s71_s10  }
  0x44   : > { %s233_s0 = sand.u32 1, %s2548_s20   ;;  %s1742_s8 = sshll.u32 %s2576_s27, 1 }
  0x45   : > { %p4372_p9 = scmp.eq.s32.totalorder %s2580_s28, 0  ;;  %s1741_s30 = sshll.u32 %s233_s0, 2 }
  0x46   : > { %s242_s13 = sadd.s32 %s2572_s26, %s1742_s8  ;;  %s237_s5 = scalar_lea.vmem [#allocation5], %s1741_s30 }
  0x47   : > { %p80_p13 = por %p78_p5, %p4372_p9  ;;  %s1743_s18 = sshll.u32 %s242_s13, 6 }
  0x48   : > { %s246_s21 = sshll.u32 %s237_s5, 4  ;;  %s2793_s9 = scalar_lea.hbm %s4343_s1, %s1743_s18  ;;  %s2795_s21 = int_to_ptr.vmem [resolvable:$true] %s246_s21 }
  0x49   : > { %p4373_p0 = scmp.lt.s32.totalorder %s2580_s28, 4  ;;  %s234_s8 = scalar_lea.sflag [#allocation6], %s233_s0 }
  0x4a   : > { %s2424_s5 = scalar_lea.hbm %s2793_s9, 64  ;;  %s2429_s10 = scalar_lea.hbm %s4343_s1, 256 }
  0x4b   : > { %p2799_p3 = pnand %p4373_p0, %p80_p13  ;;  %p2425_p5 = scmp.ne.s32.totalorder %s2793_s9, %s2424_s5 }
  0x4c   : > { %p2430_p1 = scmp.lt.u32.totalorder %s2793_s9, %s4343_s1  ;;  %p2431_p9 = scmp.lt.u32.totalorder %s2429_s10, %s2424_s5 }
  0x4d   : > { %p2426_p6 = pneg %p2799_p3  ;;  %p2433_p0 = scmp.lt.u32.totalorder %s2424_s5, %s2793_s9 }
  0x4e   : > { %p2432_p13 = por %p2431_p9, %p2430_p1 }
  0x4f   : > { %p2427_p11 = pnand %p2426_p6, %p2425_p5 }
  0x50   : > { %p2434_p7 = por %p2433_p0, %p2432_p13 }
  0x51   : > { %p2428_p12 = pneg %p2427_p11 }
  0x53   : > { %p2435_p10 = pnand %p2434_p7, %p2428_p12 }
  0x55   : > { %2438 = shalt.err (!%p2435_p10)
}
  0x56   : > { %s2439_s0 = scalar_lea.vmem %s2795_s21, 64  ;;  %s2585_s16 = smov [#allocation5]  }
  0x57   : > { %p2440_p5 = scmp.ne.s32.totalorder %s2795_s21, %s2439_s0  ;;  %s2444_s18 = sshll.u32 %s2585_s16, 4  ;;  %s2445_s18 = int_to_ptr.vmem [resolvable:$false] %s2444_s18 }
  0x58   : > { %s2446_s30 = scalar_lea.vmem %s2445_s18, 128  ;;  %p2447_p4 = scmp.lt.s32.totalorder %s2795_s21, %s2445_s18 }
  0x59   : > { %p2442_p11 = pnand %p2440_p5, %p2426_p6  ;;  %p2448_p1 = scmp.lt.s32.totalorder %s2446_s30, %s2439_s0 }
  0x5b   : > { %p2443_p8 = pneg %p2442_p11  ;;  %p2449_p9 = por %p2448_p1, %p2447_p4 }
  0x5d   : > { %p2450_p13 = pnand %p2449_p9, %p2443_p8 }
  0x5f   : > { %2453 = shalt.err (!%p2450_p13)
}
  0x60   : > { %2291 = dma.hbm_to_vmem [thread:$0]  (!%p2799_p3), %s2793_s9, 64, %s2795_s21, %s234_s8  }
  0x61   : > { %266 = sbr.rel (%p2731_p2) target bundleno = 492 (0x1ec), region = 40  ;;  %s268_s5 = sand.u32 (!%p2731_p2), 1, %s2556_s22  }
  0x62   : > { %s1745_s10 = sshll.u32 (!%p2731_p2), %s268_s5, 5  ;;  %s269_s13 = scalar_lea.sflag (!%p2731_p2), [#allocation3], %s268_s5 }
  0x63   : > { %s2831_s11 = scalar_lea.vmem (!%p2731_p2), [#allocation2], %s1745_s10  ;;  %p4375_p10 = scmp.ne.s32.totalorder (!%p2731_p2), %s4366_s12, 0 }
  0x68   : > { %2527 = dma.done.wait (%p4375_p10), %s269_s13, 512  }
  0x69   : > { %2529 = vsyncadd (%p4375_p10), %s269_s13, 4294966784  ;;  %s2838_s29 = sand.u32 1, %s2544_s19   ;;  %p4376_p2 = scmp.ne.s32.totalorder %s4368_s14, 0 }
  0x6a   : > { %s1746_s6 = sshll.u32 %s2838_s29, 2  ;;  %s278_s9 = scalar_lea.sflag [#allocation6], %s2838_s29 }
  0x6b   : > { %s281_s21 = scalar_lea.vmem [#allocation5], %s1746_s6 }
  0x6c   : > { %2531 = dma.done.wait (%p4376_p2), %s278_s9, 64  }
  0x6d   : > { %2533 = vsyncadd (%p4376_p2), %s278_s9, 4294967232  ;;  %p321_p4 = scmp.lt.s32.totalorder %s2568_s25, 1  ;;  %p323_p8 = scmp.lt.s32.totalorder %s2564_s24, 1  ;;  %v437_v0 = vlaneseq  ;;  %v2586_v2 = vmov 0   ;;  %vm356_vm0 = vcmask 1043456   ;;  %vm349_vm1 = vcmask 31744  }
  0x6e   : > { %2393 = vset.pattern.permute.xlu0 %v2586_v2  ;;  %v333_v11 = vld [vmem:[%s281_s21] sm:$0xf]  ;;  %v336_v14 = vld [vmem:[%s4345_s3 + $0x8] sm:$0xff]  ;;  %v2587_v27 = vmov 1.0|1.0   ;;  %v332_v50 = vld [vmem:[%s2831_s11 + $0x18] sm:$0xff] }
  0x6f   : > { %s322_s12 = scalar_select %p321_p4, %s2568_s25, 1  ;;  %v2849_v1 = vshrl.u32 %v437_v0, 7  ;;  %v335_v13 = vld [vmem:[%s4345_s3] sm:$0xff]  ;;  %2274 = vmatprep.subr.msk.mxu0 %vm356_vm0, %v333_v11  ;;  %v338_v32 = vld [vmem:[%s4346_s4 + $0x8] sm:$0xff]  ;;  %v331_v54 = vld [vmem:[%s2831_s11 + $0x10] sm:$0xff] }
  0x70   : > { %s324_s8 = scalar_select %p323_p8, %s2564_s24, 1  ;;  %2276 = vmatprep.mubr.msk.f32.mxu0 %vm349_vm1, %v335_v13  ;;  %2275 = vmatpush3.msk.msra.mxu0 %vm356_vm0, %v333_v11  ;;  %v337_v26 = vld [vmem:[%s4346_s4] sm:$0xff]  ;;  %v330_v49 = vld [vmem:[%s2831_s11 + $0x8] sm:$0xff] }
  0x71   : > { %s1749_s0 = sshll.u32 %s322_s12, 4  ;;  %v472_v3 = vsub.s32 0, %v2849_v1  ;;  %v476_v4 = vsub.s32 1, %v2849_v1  ;;  %v480_v5 = vsub.s32 2, %v2849_v1  ;;  %v484_v6 = vsub.s32 3, %v2849_v1  ;;  %2277 = vmatmul.mubr.msk.f32.vlgmr.msra.gmra.mrb[0].mxu0 %vm349_vm1, %v336_v14  ;;  %341 = vperm.xlu0 %2393, %v337_v26   ;;  %v329_v53 = vld [vmem:[%s2831_s11] sm:$0xff] }
  0x72   : > { %s1748_s16 = sshll.u32 %s324_s8, 3  ;;  %v488_v7 = vsub.s32 4, %v2849_v1  ;;  %v492_v8 = vsub.s32 5, %v2849_v1  ;;  %v496_v9 = vsub.s32 6, %v2849_v1  ;;  %v500_v10 = vsub.s32 7, %v2849_v1  ;;  %s1747_s11 = sshll.u32 %s2838_s29, 4 }
  0x73   : > { %s327_s14 = sadd.s32 %s1749_s0, %s1748_s16  ;;  %v2864_v12 = vadd.s32 8, %v2849_v1  ;;  %v2875_v16 = vadd.s32 16, %v2849_v1  ;;  %v2878_v17 = vadd.s32 24, %v2849_v1  ;;  %v2923_v28 = vadd.s32 32, %v2849_v1  ;;  %s2266_s16 = sshll.u32 %s2568_s25, 2 }
  0x74   : > { %s328_s5 = scalar_lea.vmem %s4344_s2, %s327_s14  ;;  %v2926_v29 = vadd.s32 40, %v2849_v1  ;;  %v2949_v30 = vadd.s32 48, %v2849_v1  ;;  %v2952_v31 = vadd.s32 56, %v2849_v1  ;;  %v2978_v33 = vadd.s32 64, %v2849_v1  ;;  %s1602_s14 = sadd.s32 %s2564_s24, %s2266_s16 }
  0x75   : > { %v334_v15 = vld [vmem:[%s328_s5] sm:$0xff]  ;;  %v2981_v34 = vadd.s32 72, %v2849_v1  ;;  %346 = vperm.xlu0 %2393, %v338_v32   ;;  %v3004_v35 = vadd.s32 80, %v2849_v1  ;;  %v3007_v36 = vadd.s32 88, %v2849_v1  ;;  %v3030_v37 = vadd.s32 96, %v2849_v1  ;;  %s320_s18 = scalar_lea.vmem [#allocation7], %s1747_s11 }
  0x76   : > { %v2880_v18 = vrot.slane %v334_v15, %v472_v3  ;;  %v2882_v19 = vrot.slane %v334_v15, %v476_v4  ;;  %v2884_v20 = vrot.slane %v334_v15, %v480_v5  ;;  %v2886_v21 = vrot.slane %v334_v15, %v484_v6  ;;  %s4534_s30 = sld [smem:[#allocation14_spill]]  ;;  %s1605_s5 = sshll.u32 %s320_s18, 4  ;;  %s4274_s5 = int_to_ptr.vmem [resolvable:$true] %s1605_s5 }
  0x77   : > { %v2889_v22 = vrot.slane %v334_v15, %v488_v7  ;;  %v2891_v23 = vrot.slane %v334_v15, %v492_v8  ;;  %v2893_v24 = vrot.slane %v334_v15, %v496_v9  ;;  %v2895_v25 = vrot.slane %v334_v15, %v500_v10  ;;  %s2267_s10 = sshll.u32 %s1602_s14, 7  ;;  %s4535_s13 = sld [smem:[#allocation16_spill]] }
  0x78   : > { %vm503_vm2 = vcmp.eq.s32.totalorder %v2849_v1, %v2882_v19  ;;  %vm511_vm3 = vcmp.eq.s32.totalorder %v2864_v12, %v2882_v19  ;;  %vm502_vm4 = vcmp.eq.s32.totalorder %v2849_v1, %v2880_v18  ;;  %vm510_vm5 = vcmp.eq.s32.totalorder %v2864_v12, %v2880_v18  ;;  %s1591_s9 = scalar_lea.sflag [#allocation4], %s2838_s29  ;;  %s2454_s21 = scalar_lea.vmem %s4274_s5, 256 }
  0x79   : > { %vm2009_vm6 = vmpackc.low %vm511_vm3, %vm503_vm2  ;;  %vm505_vm7 = vcmp.eq.s32.totalorder %v2849_v1, %v2886_v21  ;;  %vm513_vm8 = vcmp.eq.s32.totalorder %v2864_v12, %v2886_v21  ;;  %vm504_vm9 = vcmp.eq.s32.totalorder %v2849_v1, %v2884_v20  ;;  %vm512_vm10 = vcmp.eq.s32.totalorder %v2864_v12, %v2884_v20  ;;  %p2455_p7 = scmp.ne.s32.totalorder %s4274_s5, %s2454_s21  ;;  %s2588_s12 = smov [#allocation7]  }
  0x7a   : > { %2010 = vmatprep.subr.msk.bf16.mxu1 %vm2009_vm6, %v2587_v27  ;;  %vm2011_vm11 = vmpackc.low %vm510_vm5, %vm502_vm4  ;;  %vm519_vm12 = vcmp.eq.s32.totalorder %v2875_v16, %v2882_v19  ;;  %vm527_vm13 = vcmp.eq.s32.totalorder %v2878_v17, %v2882_v19  ;;  %vm518_vm15 = vcmp.eq.s32.totalorder %v2875_v16, %v2880_v18  ;;  %vm526_vm0 = vcmp.eq.s32.totalorder %v2878_v17, %v2880_v18  ;;  %s2458_s8 = sshll.u32 %s2588_s12, 4  ;;  %s2459_s8 = int_to_ptr.vmem [resolvable:$false] %s2458_s8 }
  0x7b   : > { %2012 = vmatpush1.bf16.msk.msra.mxu1 %vm2011_vm11, %v2587_v27  ;;  %vm2073_vm14 = vmpackc.low %vm513_vm8, %vm505_vm7  ;;  %vm521_vm2 = vcmp.eq.s32.totalorder %v2875_v16, %v2886_v21  ;;  %vm529_vm3 = vcmp.eq.s32.totalorder %v2878_v17, %v2886_v21  ;;  %vm520_vm5 = vcmp.eq.s32.totalorder %v2875_v16, %v2884_v20  ;;  %vm528_vm6 = vcmp.eq.s32.totalorder %v2878_v17, %v2884_v20  ;;  %s2460_s0 = scalar_lea.vmem %s2459_s8, 512  ;;  %p2461_p0 = scmp.lt.s32.totalorder %s4274_s5, %s2459_s8 }
  0x7c   : > { %2074 = vmatprep.subr.msk.bf16.mxu0 %vm2073_vm14, %v2587_v27  ;;  %vm2075_vm1 = vmpackc.low %vm512_vm10, %vm504_vm9  ;;  %vm535_vm8 = vcmp.eq.s32.totalorder %v2923_v28, %v2882_v19  ;;  %vm543_vm9 = vcmp.eq.s32.totalorder %v2926_v29, %v2882_v19  ;;  %vm534_vm11 = vcmp.eq.s32.totalorder %v2923_v28, %v2880_v18  ;;  %vm537_vm14 = vcmp.eq.s32.totalorder %v2923_v28, %v2886_v21  ;;  %p4536_p3 = scmp.ne.s32.totalorder %s4534_s30, 0  ;;  %p2462_p5 = scmp.lt.s32.totalorder %s2460_s0, %s2454_s21 }
  0x7d   : > { %2076 = vmatpush1.bf16.msk.msra.mxu0 %vm2075_vm1, %v2587_v27  ;;  %vm2013_vm4 = vmpackc.low %vm527_vm13, %vm519_vm12  ;;  %vm542_vm12 = vcmp.eq.s32.totalorder %v2926_v29, %v2880_v18  ;;  %vm536_vm1 = vcmp.eq.s32.totalorder %v2923_v28, %v2884_v20  ;;  %v3033_v38 = vadd.s32 104, %v2849_v1  ;;  %v3051_v39 = vadd.s32 112, %v2849_v1  ;;  %s4279_s6 = scalar_lea.hbm %s4535_s13, %s2267_s10 }
  0x7e   : > { %2014 = vmatprep.subr.msk.bf16.mxu1 %vm2013_vm4, %v2587_v27  ;;  %vm2015_vm7 = vmpackc.low %vm526_vm0, %vm518_vm15  ;;  %vm545_vm15 = vcmp.eq.s32.totalorder %v2926_v29, %v2886_v21  ;;  %vm551_vm4 = vcmp.eq.s32.totalorder %v2949_v30, %v2882_v19  ;;  %v3059_v40 = vadd.s32 120, %v2849_v1  ;;  %v3067_v41 = vadd.s32 128, %v2849_v1  ;;  %p2456_p6 = pnand %p2455_p7, %p4536_p3  ;;  %p2463_p11 = por %p2462_p5, %p2461_p0 }
  0x7f   : > { %2016 = vmatpush1.bf16.msk.msra.mxu1 %vm2015_vm7, %v2587_v27  ;;  %vm2077_vm10 = vmpackc.low %vm529_vm3, %vm521_vm2  ;;  %vm544_vm2 = vcmp.eq.s32.totalorder %v2926_v29, %v2884_v20  ;;  %vm550_vm7 = vcmp.eq.s32.totalorder %v2949_v30, %v2880_v18  ;;  %v3070_v42 = vadd.s32 136, %v2849_v1  ;;  %v3113_v43 = vadd.s32 144, %v2849_v1 }
  0x80   : > { %2078 = vmatprep.subr.msk.bf16.mxu0 %vm2077_vm10, %v2587_v27  ;;  %vm2079_vm13 = vmpackc.low %vm528_vm6, %vm520_vm5  ;;  %vm559_vm5 = vcmp.eq.s32.totalorder %v2952_v31, %v2882_v19  ;;  %vm553_vm10 = vcmp.eq.s32.totalorder %v2949_v30, %v2886_v21  ;;  %v3129_v44 = vadd.s32 152, %v2849_v1  ;;  %v3143_v45 = vadd.s32 160, %v2849_v1  ;;  %p2457_p12 = pneg %p2456_p6 }
  0x81   : > { %2080 = vmatpush1.bf16.msk.msra.mxu0 %vm2079_vm13, %v2587_v27  ;;  %vm2017_vm0 = vmpackc.low %vm543_vm9, %vm535_vm8  ;;  %vm558_vm8 = vcmp.eq.s32.totalorder %v2952_v31, %v2880_v18  ;;  %vm552_vm13 = vcmp.eq.s32.totalorder %v2949_v30, %v2884_v20  ;;  %v3146_v46 = vadd.s32 168, %v2849_v1  ;;  %v3190_v47 = vadd.s32 176, %v2849_v1 }
  0x82   : > { %2018 = vmatprep.subr.msk.bf16.mxu1 %vm2017_vm0, %v2587_v27  ;;  %vm2019_vm3 = vmpackc.low %vm542_vm12, %vm534_vm11  ;;  %vm561_vm11 = vcmp.eq.s32.totalorder %v2952_v31, %v2886_v21  ;;  %vm567_vm0 = vcmp.eq.s32.totalorder %v2978_v33, %v2882_v19  ;;  %v3193_v48 = vadd.s32 184, %v2849_v1  ;;  %v3239_v51 = vadd.s32 192, %v2849_v1  ;;  %p2464_p1 = pnand %p2463_p11, %p2457_p12 }
  0x83   : > { %2020 = vmatpush1.bf16.msk.msra.mxu1 %vm2019_vm3, %v2587_v27  ;;  %vm2081_vm6 = vmpackc.low %vm545_vm15, %vm537_vm14  ;;  %vm560_vm14 = vcmp.eq.s32.totalorder %v2952_v31, %v2884_v20  ;;  %vm566_vm3 = vcmp.eq.s32.totalorder %v2978_v33, %v2880_v18  ;;  %v3242_v52 = vadd.s32 200, %v2849_v1  ;;  %v3260_v55 = vadd.s32 208, %v2849_v1 }
  0x84   : > { %2082 = vmatprep.subr.msk.bf16.mxu0 %vm2081_vm6, %v2587_v27  ;;  %vm2083_vm9 = vmpackc.low %vm544_vm2, %vm536_vm1  ;;  %vm575_vm1 = vcmp.eq.s32.totalorder %v2981_v34, %v2882_v19  ;;  %vm569_vm6 = vcmp.eq.s32.totalorder %v2978_v33, %v2886_v21  ;;  %v3275_v56 = vpack.c.bf16 %v332_v50, %v330_v49  ;;  %v3291_v57 = vadd.s32 216, %v2849_v1 }
  0x85   : > { %2084 = vmatpush1.bf16.msk.msra.mxu0 %vm2083_vm9, %v2587_v27  ;;  %vm2021_vm12 = vmpackc.low %vm559_vm5, %vm551_vm4  ;;  %vm574_vm4 = vcmp.eq.s32.totalorder %v2981_v34, %v2880_v18  ;;  %vm568_vm9 = vcmp.eq.s32.totalorder %v2978_v33, %v2884_v20  ;;  %v3294_v58 = vadd.s32 224, %v2849_v1  ;;  %v3297_v59 = vadd.s32 232, %v2849_v1 }
  0x86   : > { %2022 = vmatprep.subr.msk.bf16.mxu1 %vm2021_vm12, %v2587_v27  ;;  %vm2023_vm15 = vmpackc.low %vm558_vm8, %vm550_vm7  ;;  %vm577_vm7 = vcmp.eq.s32.totalorder %v2981_v34, %v2886_v21  ;;  %vm583_vm12 = vcmp.eq.s32.totalorder %v3004_v35, %v2882_v19  ;;  %v3299_v60 = vpack.c.bf16 %v331_v54, %v329_v53  ;;  %v3313_v61 = vadd.s32 240, %v2849_v1  ;;  %1430 = vmatprep.mubr.bf16.mxu1 %v3275_v56 }
  0x87   : > { %2024 = vmatpush1.bf16.msk.msra.mxu1 %vm2023_vm15, %v2587_v27  ;;  %vm2085_vm2 = vmpackc.low %vm561_vm11, %vm553_vm10  ;;  %vm576_vm10 = vcmp.eq.s32.totalorder %v2981_v34, %v2884_v20  ;;  %vm582_vm15 = vcmp.eq.s32.totalorder %v3004_v35, %v2880_v18  ;;  %v3334_v62 = vadd.s32 248, %v2849_v1  ;;  %1473 = vmatprep.mubr.bf16.mxu0 %v3275_v56 }
  0x88   : > { %2086 = vmatprep.subr.msk.bf16.mxu0 %vm2085_vm2, %v2587_v27  ;;  %vm2087_vm5 = vmpackc.low %vm560_vm14, %vm552_vm13  ;;  %vm591_vm13 = vcmp.eq.s32.totalorder %v3007_v36, %v2882_v19  ;;  %vm585_vm2 = vcmp.eq.s32.totalorder %v3004_v35, %v2886_v21 }
  0x89   : > { %2088 = vmatpush1.bf16.msk.msra.mxu0 %vm2087_vm5, %v2587_v27  ;;  %vm2025_vm8 = vmpackc.low %vm575_vm1, %vm567_vm0  ;;  %vm590_vm0 = vcmp.eq.s32.totalorder %v3007_v36, %v2880_v18  ;;  %vm584_vm5 = vcmp.eq.s32.totalorder %v3004_v35, %v2884_v20 }
  0x8a   : > { %2026 = vmatprep.subr.msk.bf16.mxu1 %vm2025_vm8, %v2587_v27  ;;  %vm2027_vm11 = vmpackc.low %vm574_vm4, %vm566_vm3  ;;  %vm593_vm3 = vcmp.eq.s32.totalorder %v3007_v36, %v2886_v21  ;;  %vm599_vm8 = vcmp.eq.s32.totalorder %v3030_v37, %v2882_v19 }
  0x8b   : > { %2028 = vmatpush1.bf16.msk.msra.mxu1 %vm2027_vm11, %v2587_v27  ;;  %vm2089_vm14 = vmpackc.low %vm577_vm7, %vm569_vm6  ;;  %vm592_vm6 = vcmp.eq.s32.totalorder %v3007_v36, %v2884_v20  ;;  %vm598_vm11 = vcmp.eq.s32.totalorder %v3030_v37, %v2880_v18 }
  0x8c   : > { %2090 = vmatprep.subr.msk.bf16.mxu0 %vm2089_vm14, %v2587_v27  ;;  %vm2091_vm1 = vmpackc.low %vm576_vm10, %vm568_vm9  ;;  %vm607_vm9 = vcmp.eq.s32.totalorder %v3033_v38, %v2882_v19  ;;  %vm601_vm14 = vcmp.eq.s32.totalorder %v3030_v37, %v2886_v21 }
  0x8d   : > { %2092 = vmatpush1.bf16.msk.msra.mxu0 %vm2091_vm1, %v2587_v27  ;;  %vm2029_vm4 = vmpackc.low %vm591_vm13, %vm583_vm12  ;;  %vm606_vm12 = vcmp.eq.s32.totalorder %v3033_v38, %v2880_v18  ;;  %vm608_vm1 = vcmp.eq.s32.totalorder %v3033_v38, %v2884_v20 }
  0x8e   : > { %2030 = vmatprep.subr.msk.bf16.mxu1 %vm2029_vm4, %v2587_v27  ;;  %vm2031_vm7 = vmpackc.low %vm590_vm0, %vm582_vm15  ;;  %vm609_vm15 = vcmp.eq.s32.totalorder %v3033_v38, %v2886_v21  ;;  %vm600_vm0 = vcmp.eq.s32.totalorder %v3030_v37, %v2884_v20  ;;  %vm614_vm4 = vcmp.eq.s32.totalorder %v3051_v39, %v2880_v18 }
  0x8f   : > { %2032 = vmatpush1.bf16.msk.msra.mxu1 %vm2031_vm7, %v2587_v27  ;;  %vm2093_vm10 = vmpackc.low %vm593_vm3, %vm585_vm2  ;;  %vm615_vm3 = vcmp.eq.s32.totalorder %v3051_v39, %v2882_v19 }
  0x90   : > { %2094 = vmatprep.subr.msk.bf16.mxu0 %vm2093_vm10, %v2587_v27  ;;  %vm2095_vm13 = vmpackc.low %vm592_vm6, %vm584_vm5  ;;  %vm617_vm5 = vcmp.eq.s32.totalorder %v3051_v39, %v2886_v21  ;;  %vm616_vm6 = vcmp.eq.s32.totalorder %v3051_v39, %v2884_v20  ;;  %vm625_vm10 = vcmp.eq.s32.totalorder %v3059_v40, %v2886_v21 }
  0x91   : > { %2096 = vmatpush1.bf16.msk.msra.mxu0 %vm2095_vm13, %v2587_v27  ;;  %vm2033_vm2 = vmpackc.low %vm607_vm9, %vm599_vm8  ;;  %vm623_vm8 = vcmp.eq.s32.totalorder %v3059_v40, %v2882_v19  ;;  %vm622_vm9 = vcmp.eq.s32.totalorder %v3059_v40, %v2880_v18  ;;  %vm631_vm13 = vcmp.eq.s32.totalorder %v3067_v41, %v2882_v19 }
  0x92   : > { %2034 = vmatprep.subr.msk.bf16.mxu1 %vm2033_vm2, %v2587_v27  ;;  %vm2035_vm7 = vmpackc.low %vm606_vm12, %vm598_vm11  ;;  %vm624_vm12 = vcmp.eq.s32.totalorder %v3059_v40, %v2884_v20  ;;  %vm639_vm2 = vcmp.eq.s32.totalorder %v3070_v42, %v2882_v19 }
  0x93   : > { %2036 = vmatpush1.bf16.msk.msra.mxu1 %vm2035_vm7, %v2587_v27  ;;  %vm2097_vm11 = vmpackc.low %vm609_vm15, %vm601_vm14  ;;  %vm649_vm7 = vcmp.eq.s32.totalorder %v3113_v43, %v2886_v21  ;;  %vm664_vm15 = vcmp.eq.s32.totalorder %v3143_v45, %v2884_v20 }
  0x94   : > { %2098 = vmatprep.subr.msk.bf16.mxu0 %vm2097_vm11, %v2587_v27  ;;  %vm2099_vm14 = vmpackc.low %vm608_vm1, %vm600_vm0  ;;  %vm633_vm1 = vcmp.eq.s32.totalorder %v3067_v41, %v2886_v21  ;;  %vm641_vm11 = vcmp.eq.s32.totalorder %v3070_v42, %v2886_v21 }
  0x95   : > { %2100 = vmatpush1.bf16.msk.msra.mxu0 %vm2099_vm14, %v2587_v27  ;;  %vm2037_vm0 = vmpackc.low %vm623_vm8, %vm615_vm3  ;;  %vm647_vm8 = vcmp.eq.s32.totalorder %v3113_v43, %v2882_v19  ;;  %vm646_vm14 = vcmp.eq.s32.totalorder %v3113_v43, %v2880_v18 }
  0x96   : > { %2038 = vmatprep.subr.msk.bf16.mxu1 %vm2037_vm0, %v2587_v27  ;;  %vm2039_vm3 = vmpackc.low %vm622_vm9, %vm614_vm4  ;;  %vm655_vm9 = vcmp.eq.s32.totalorder %v3129_v44, %v2882_v19  ;;  %vm654_vm0 = vcmp.eq.s32.totalorder %v3129_v44, %v2880_v18 }
  0x97   : > { %2040 = vmatpush1.bf16.msk.msra.mxu1 %vm2039_vm3, %v2587_v27  ;;  %vm2101_vm4 = vmpackc.low %vm625_vm10, %vm617_vm5  ;;  %vm657_vm10 = vcmp.eq.s32.totalorder %v3129_v44, %v2886_v21  ;;  %vm688_vm3 = vcmp.eq.s32.totalorder %v3193_v48, %v2884_v20 }
  0x98   : > { %2102 = vmatprep.subr.msk.bf16.mxu0 %vm2101_vm4, %v2587_v27  ;;  %vm2103_vm5 = vmpackc.low %vm624_vm12, %vm616_vm6  ;;  %vm662_vm12 = vcmp.eq.s32.totalorder %v3143_v45, %v2880_v18  ;;  %vm673_vm4 = vcmp.eq.s32.totalorder %v3146_v46, %v2886_v21 }
  0x99   : > { %2104 = vmatpush1.bf16.msk.msra.mxu0 %vm2103_vm5, %v2587_v27  ;;  %vm2041_vm6 = vmpackc.low %vm639_vm2, %vm631_vm13  ;;  %vm4377_vm5 = vcmp.eq.s32.totalorder %v3067_v41, %v2880_v18  ;;  %vm4378_vm13 = vcmp.eq.s32.totalorder %v3070_v42, %v2880_v18 }
  0x9a   : > { %2042 = vmatprep.subr.msk.bf16.mxu1 %vm2041_vm6, %v2587_v27  ;;  %vm2043_vm2 = vmpackc.low %vm4378_vm13, %vm4377_vm5  ;;  %vm686_vm5 = vcmp.eq.s32.totalorder %v3193_v48, %v2880_v18  ;;  %vm681_vm13 = vcmp.eq.s32.totalorder %v3190_v47, %v2886_v21 }
  0x9b   : > { %2044 = vmatpush1.bf16.msk.msra.mxu1 %vm2043_vm2, %v2587_v27  ;;  %vm2105_vm6 = vmpackc.low %vm641_vm11, %vm633_vm1  ;;  %vm4379_vm2 = vcmp.eq.s32.totalorder %v3067_v41, %v2884_v20  ;;  %vm4380_vm1 = vcmp.eq.s32.totalorder %v3070_v42, %v2884_v20 }
  0x9c   : > { %2106 = vmatprep.subr.msk.bf16.mxu0 %vm2105_vm6, %v2587_v27  ;;  %vm2107_vm11 = vmpackc.low %vm4380_vm1, %vm4379_vm2  ;;  %vm680_vm1 = vcmp.eq.s32.totalorder %v3190_v47, %v2884_v20  ;;  %vm4382_vm6 = vcmp.eq.s32.totalorder %v3129_v44, %v2884_v20 }
  0x9d   : > { %2108 = vmatpush1.bf16.msk.msra.mxu0 %vm2107_vm11, %v2587_v27  ;;  %vm2045_vm2 = vmpackc.low %vm655_vm9, %vm647_vm8 }
  0x9e   : > { %2046 = vmatprep.subr.msk.bf16.mxu1 %vm2045_vm2, %v2587_v27  ;;  %vm2047_vm8 = vmpackc.low %vm654_vm0, %vm646_vm14  ;;  %vm696_vm14 = vcmp.eq.s32.totalorder %v3239_v51, %v2884_v20 }
  0x9f   : > { %2048 = vmatpush1.bf16.msk.msra.mxu1 %vm2047_vm8, %v2587_v27  ;;  %vm2109_vm0 = vmpackc.low %vm657_vm10, %vm649_vm7  ;;  %vm4381_vm10 = vcmp.eq.s32.totalorder %v3113_v43, %v2884_v20 }
  0xa0   : > { %2110 = vmatprep.subr.msk.bf16.mxu0 %vm2109_vm0, %v2587_v27  ;;  %vm2111_vm2 = vmpackc.low %vm4382_vm6, %vm4381_vm10  ;;  %vm4383_vm6 = vcmp.eq.s32.totalorder %v3143_v45, %v2882_v19  ;;  %vm4384_vm10 = vcmp.eq.s32.totalorder %v3146_v46, %v2882_v19  ;;  %vm711_vm0 = vcmp.eq.s32.totalorder %v3260_v55, %v2882_v19 }
  0xa1   : > { %2112 = vmatpush1.bf16.msk.msra.mxu0 %vm2111_vm2, %v2587_v27  ;;  %vm2049_vm8 = vmpackc.low %vm4384_vm10, %vm4383_vm6  ;;  %vm4385_vm6 = vcmp.eq.s32.totalorder %v3146_v46, %v2880_v18  ;;  %vm710_vm2 = vcmp.eq.s32.totalorder %v3260_v55, %v2880_v18 }
  0xa2   : > { %2050 = vmatprep.subr.msk.bf16.mxu1 %vm2049_vm8, %v2587_v27  ;;  %vm2051_vm10 = vmpackc.low %vm4385_vm6, %vm662_vm12  ;;  %vm4386_vm12 = vcmp.eq.s32.totalorder %v3143_v45, %v2886_v21  ;;  %vm734_vm8 = vcmp.eq.s32.totalorder %v3297_v59, %v2880_v18 }
  0xa3   : > { %2052 = vmatpush1.bf16.msk.msra.mxu1 %vm2051_vm10, %v2587_v27  ;;  %vm2113_vm6 = vmpackc.low %vm673_vm4, %vm4386_vm12  ;;  %vm4387_vm4 = vcmp.eq.s32.totalorder %v3146_v46, %v2884_v20  ;;  %vm712_vm10 = vcmp.eq.s32.totalorder %v3260_v55, %v2884_v20 }
  0xa4   : > { %2114 = vmatprep.subr.msk.bf16.mxu0 %vm2113_vm6, %v2587_v27  ;;  %vm2115_vm12 = vmpackc.low %vm4387_vm4, %vm664_vm15  ;;  %vm4388_vm15 = vcmp.eq.s32.totalorder %v3190_v47, %v2882_v19  ;;  %vm4389_vm4 = vcmp.eq.s32.totalorder %v3193_v48, %v2882_v19  ;;  %vm727_vm6 = vcmp.eq.s32.totalorder %v3294_v58, %v2882_v19 }
  0xa5   : > { %2116 = vmatpush1.bf16.msk.msra.mxu0 %vm2115_vm12, %v2587_v27  ;;  %vm2053_vm7 = vmpackc.low %vm4389_vm4, %vm4388_vm15  ;;  %vm4390_vm15 = vcmp.eq.s32.totalorder %v3190_v47, %v2880_v18  ;;  %vm726_vm12 = vcmp.eq.s32.totalorder %v3294_v58, %v2880_v18 }
  0xa6   : > { %2054 = vmatprep.subr.msk.bf16.mxu1 %vm2053_vm7, %v2587_v27  ;;  %vm2055_vm4 = vmpackc.low %vm686_vm5, %vm4390_vm15  ;;  %vm4391_vm5 = vcmp.eq.s32.totalorder %v3193_v48, %v2886_v21 }
  0xa7   : > { %2056 = vmatpush1.bf16.msk.msra.mxu1 %vm2055_vm4, %v2587_v27  ;;  %vm2117_vm15 = vmpackc.low %vm4391_vm5, %vm681_vm13  ;;  %vm653_vm5 = vcmp.eq.s32.totalorder %v3113_v43, %v2895_v25  ;;  %vm4426_vm4 = vcmp.eq.s32.totalorder %v2878_v17, %v2895_v25 }
  0xa8   : > { %2118 = vmatprep.subr.msk.bf16.mxu0 %vm2117_vm15, %v2587_v27  ;;  %vm2119_vm13 = vmpackc.low %vm688_vm3, %vm680_vm1  ;;  %vm4392_vm3 = vcmp.eq.s32.totalorder %v3239_v51, %v2882_v19  ;;  %vm4393_vm1 = vcmp.eq.s32.totalorder %v3242_v52, %v2882_v19  ;;  %vm752_vm15 = vcmp.eq.s32.totalorder %v3334_v62, %v2884_v20 }
  0xa9   : > { %2120 = vmatpush1.bf16.msk.msra.mxu0 %vm2119_vm13, %v2587_v27  ;;  %vm2057_vm9 = vmpackc.low %vm4393_vm1, %vm4392_vm3  ;;  %vm4394_vm3 = vcmp.eq.s32.totalorder %v3239_v51, %v2880_v18  ;;  %vm4395_vm1 = vcmp.eq.s32.totalorder %v3242_v52, %v2880_v18  ;;  %vm742_vm13 = vcmp.eq.s32.totalorder %v3313_v61, %v2880_v18 }
  0xaa   : > { %2058 = vmatprep.subr.msk.bf16.mxu1 %vm2057_vm9, %v2587_v27  ;;  %vm2059_vm11 = vmpackc.low %vm4395_vm1, %vm4394_vm3  ;;  %vm4396_vm3 = vcmp.eq.s32.totalorder %v3239_v51, %v2886_v21  ;;  %vm4397_vm1 = vcmp.eq.s32.totalorder %v3242_v52, %v2886_v21  ;;  %vm745_vm9 = vcmp.eq.s32.totalorder %v3313_v61, %v2886_v21 }
  0xab   : > { %2060 = vmatpush1.bf16.msk.msra.mxu1 %vm2059_vm11, %v2587_v27  ;;  %vm2121_vm7 = vmpackc.low %vm4397_vm1, %vm4396_vm3  ;;  %vm4398_vm3 = vcmp.eq.s32.totalorder %v3242_v52, %v2884_v20  ;;  %vm744_vm11 = vcmp.eq.s32.totalorder %v3313_v61, %v2884_v20 }
  0xac   : > { %2122 = vmatprep.subr.msk.bf16.mxu0 %vm2121_vm7, %v2587_v27  ;;  %vm2123_vm1 = vmpackc.low %vm4398_vm3, %vm696_vm14  ;;  %vm4399_vm14 = vcmp.eq.s32.totalorder %v3291_v57, %v2882_v19  ;;  %vm642_vm7 = vcmp.eq.s32.totalorder %v3070_v42, %v2889_v22 }
  0xad   : > { %2124 = vmatpush1.bf16.msk.msra.mxu0 %vm2123_vm1, %v2587_v27  ;;  %vm2061_vm3 = vmpackc.low %vm4399_vm14, %vm711_vm0  ;;  %vm4400_vm0 = vcmp.eq.s32.totalorder %v3291_v57, %v2880_v18  ;;  %vm4428_vm1 = vcmp.eq.s32.totalorder %v2878_v17, %v2893_v24 }
  0xae   : > { %2062 = vmatprep.subr.msk.bf16.mxu1 %vm2061_vm3, %v2587_v27  ;;  %vm2063_vm14 = vmpackc.low %vm4400_vm0, %vm710_vm2  ;;  %vm4401_vm3 = vcmp.eq.s32.totalorder %v3260_v55, %v2886_v21  ;;  %vm4402_vm2 = vcmp.eq.s32.totalorder %v3291_v57, %v2886_v21 }
  0xaf   : > { %2064 = vmatpush1.bf16.msk.msra.mxu1 %vm2063_vm14, %v2587_v27  ;;  %vm2125_vm0 = vmpackc.low %vm4402_vm2, %vm4401_vm3  ;;  %vm4403_vm14 = vcmp.eq.s32.totalorder %v3291_v57, %v2884_v20  ;;  %vm644_vm2 = vcmp.eq.s32.totalorder %v3070_v42, %v2893_v24 }
  0xb0   : > { %2126 = vmatprep.subr.msk.bf16.mxu0 %vm2125_vm0, %v2587_v27  ;;  %vm2127_vm3 = vmpackc.low %vm4403_vm14, %vm712_vm10  ;;  %vm4404_vm10 = vcmp.eq.s32.totalorder %v3297_v59, %v2882_v19  ;;  %vm658_vm14 = vcmp.eq.s32.totalorder %v3129_v44, %v2889_v22 }
  0xb1   : > { %2128 = vmatpush1.bf16.msk.msra.mxu0 %vm2127_vm3, %v2587_v27  ;;  %vm2065_vm0 = vmpackc.low %vm4404_vm10, %vm727_vm6  ;;  %vm690_vm3 = vcmp.eq.s32.totalorder %v3193_v48, %v2889_v22 }
  0xb2   : > { %2066 = vmatprep.subr.msk.bf16.mxu1 %vm2065_vm0, %v2587_v27  ;;  %vm2067_vm6 = vmpackc.low %vm734_vm8, %vm726_vm12  ;;  %vm4405_vm0 = vcmp.eq.s32.totalorder %v3294_v58, %v2886_v21  ;;  %vm4406_vm8 = vcmp.eq.s32.totalorder %v3297_v59, %v2886_v21 }
  0xb3   : > { %2068 = vmatpush1.bf16.msk.msra.mxu1 %vm2067_vm6, %v2587_v27  ;;  %vm2129_vm12 = vmpackc.low %vm4406_vm8, %vm4405_vm0  ;;  %vm4407_vm6 = vcmp.eq.s32.totalorder %v3294_v58, %v2884_v20  ;;  %vm4408_vm0 = vcmp.eq.s32.totalorder %v3297_v59, %v2884_v20 }
  0xb4   : > { %2130 = vmatprep.subr.msk.bf16.mxu0 %vm2129_vm12, %v2587_v27  ;;  %vm2131_vm8 = vmpackc.low %vm4408_vm0, %vm4407_vm6  ;;  %vm4409_vm12 = vcmp.eq.s32.totalorder %v3313_v61, %v2882_v19  ;;  %vm4410_vm6 = vcmp.eq.s32.totalorder %v3334_v62, %v2882_v19 }
  0xb5   : > { %2132 = vmatpush1.bf16.msk.msra.mxu0 %vm2131_vm8, %v2587_v27  ;;  %vm2069_vm0 = vmpackc.low %vm4410_vm6, %vm4409_vm12  ;;  %vm4411_vm8 = vcmp.eq.s32.totalorder %v3334_v62, %v2880_v18  ;;  %vm692_vm6 = vcmp.eq.s32.totalorder %v3193_v48, %v2893_v24 }
  0xb6   : > { %2070 = vmatprep.subr.msk.bf16.mxu1 %vm2069_vm0, %v2587_v27  ;;  %vm2071_vm12 = vmpackc.low %vm4411_vm8, %vm742_vm13  ;;  %vm4412_vm13 = vcmp.eq.s32.totalorder %v3334_v62, %v2886_v21  ;;  %vm706_vm8 = vcmp.eq.s32.totalorder %v3242_v52, %v2889_v22 }
  0xb7   : > { %2072 = vmatpush1.bf16.msk.msra.mxu1 %vm2071_vm12, %v2587_v27  ;;  %vm2133_vm0 = vmpackc.low %vm4412_vm13, %vm745_vm9  ;;  %vm4418_vm12 = vcmp.eq.s32.totalorder %v2864_v12, %v2895_v25 }
  0xb8   : > { %2134 = vmatprep.subr.msk.bf16.mxu0 %vm2133_vm0, %v2587_v27  ;;  %vm2135_vm9 = vmpackc.low %vm752_vm15, %vm744_vm11  ;;  %vm4413_vm0 = vcmp.eq.s32.totalorder %v2849_v1, %v2891_v23  ;;  %vm4414_vm15 = vcmp.eq.s32.totalorder %v2864_v12, %v2891_v23 }
  0xb9   : > { %2136 = vmatpush1.bf16.msk.msra.mxu0 %vm2135_vm9, %v2587_v27  ;;  %vm2137_vm11 = vmpackc.low %vm4414_vm15, %vm4413_vm0  ;;  %vm4415_vm9 = vcmp.eq.s32.totalorder %v2849_v1, %v2889_v22  ;;  %vm4416_vm0 = vcmp.eq.s32.totalorder %v2864_v12, %v2889_v22 }
  0xba   : > { %1431 = vmatmul.mubr.bf16.vlgmr.msra.gmra.mrb[0].mxu1 %v3299_v60  ;;  %2138 = vmatprep.subr.msk.bf16.mxu1 %vm2137_vm11, %v2587_v27  ;;  %vm2139_vm15 = vmpackc.low %vm4416_vm0, %vm4415_vm9  ;;  %vm4417_vm11 = vcmp.eq.s32.totalorder %v2849_v1, %v2895_v25  ;;  %vm4422_vm9 = vcmp.eq.s32.totalorder %v2878_v17, %v2891_v23 }
  0xbb   : > { %2140 = vmatpush1.bf16.msk.msra.mxu1 %vm2139_vm15, %v2587_v27  ;;  %vm2201_vm10 = vmpackc.low %vm4418_vm12, %vm4417_vm11  ;;  %vm4419_vm15 = vcmp.eq.s32.totalorder %v2849_v1, %v2893_v24  ;;  %vm4420_vm12 = vcmp.eq.s32.totalorder %v2864_v12, %v2893_v24  ;;  %1516 = vmatprep.mubr.bf16.mxu1 %v3275_v56 }
  0xbc   : > { %2202 = vmatprep.subr.msk.bf16.mxu0 %vm2201_vm10, %v2587_v27  ;;  %1474 = vmatmul.mubr.bf16.vlgmr.msra.gmra.mrb[4].mxu0 %v3299_v60  ;;  %vm2203_vm11 = vmpackc.low %vm4420_vm12, %vm4419_vm15  ;;  %vm4421_vm10 = vcmp.eq.s32.totalorder %v2875_v16, %v2891_v23  ;;  %vm4430_vm15 = vcmp.eq.s32.totalorder %v2926_v29, %v2891_v23 }
  0xbd   : > { %2204 = vmatpush1.bf16.msk.msra.mxu0 %vm2203_vm11, %v2587_v27  ;;  %vm2141_vm13 = vmpackc.low %vm4422_vm9, %vm4421_vm10  ;;  %vm4423_vm11 = vcmp.eq.s32.totalorder %v2875_v16, %v2889_v22  ;;  %vm4424_vm9 = vcmp.eq.s32.totalorder %v2878_v17, %v2889_v22  ;;  %1559 = vmatprep.mubr.bf16.mxu0 %v3275_v56 }
  0xbe   : > { %2142 = vmatprep.subr.msk.bf16.mxu1 %vm2141_vm13, %v2587_v27  ;;  %vm2143_vm10 = vmpackc.low %vm4424_vm9, %vm4423_vm11  ;;  %vm4425_vm13 = vcmp.eq.s32.totalorder %v2875_v16, %v2895_v25  ;;  %vm4427_vm9 = vcmp.eq.s32.totalorder %v2875_v16, %v2893_v24 }
  0xbf   : > { %2144 = vmatpush1.bf16.msk.msra.mxu1 %vm2143_vm10, %v2587_v27  ;;  %vm2205_vm11 = vmpackc.low %vm4426_vm4, %vm4425_vm13  ;;  %vm4429_vm10 = vcmp.eq.s32.totalorder %v2923_v28, %v2891_v23  ;;  %vm4431_vm13 = vcmp.eq.s32.totalorder %v2923_v28, %v2889_v22 }
  0xc0   : > { %2206 = vmatprep.subr.msk.bf16.mxu0 %vm2205_vm11, %v2587_v27  ;;  %vm2207_vm12 = vmpackc.low %vm4428_vm1, %vm4427_vm9  ;;  %vm4432_vm11 = vcmp.eq.s32.totalorder %v2926_v29, %v2889_v22  ;;  %vm4433_vm1 = vcmp.eq.s32.totalorder %v2923_v28, %v2895_v25 }
  0xc1   : > { %2208 = vmatpush1.bf16.msk.msra.mxu0 %vm2207_vm12, %v2587_v27  ;;  %vm2145_vm4 = vmpackc.low %vm4430_vm15, %vm4429_vm10  ;;  %vm4434_vm12 = vcmp.eq.s32.totalorder %v2926_v29, %v2895_v25  ;;  %vm4435_vm15 = vcmp.eq.s32.totalorder %v2923_v28, %v2893_v24  ;;  %vm4436_vm10 = vcmp.eq.s32.totalorder %v2926_v29, %v2893_v24 }
  0xc2   : > { %2146 = vmatprep.subr.msk.bf16.mxu1 %vm2145_vm4, %v2587_v27  ;;  %vm2147_vm0 = vmpackc.low %vm4432_vm11, %vm4431_vm13  ;;  %vm4438_vm13 = vcmp.eq.s32.totalorder %v2952_v31, %v2891_v23 }
  0xc3   : > { %2148 = vmatpush1.bf16.msk.msra.mxu1 %vm2147_vm0, %v2587_v27  ;;  %vm2209_vm9 = vmpackc.low %vm4434_vm12, %vm4433_vm1  ;;  %vm4437_vm0 = vcmp.eq.s32.totalorder %v2949_v30, %v2891_v23  ;;  %vm4439_vm1 = vcmp.eq.s32.totalorder %v2949_v30, %v2889_v22  ;;  %vm4440_vm12 = vcmp.eq.s32.totalorder %v2952_v31, %v2889_v22 }
  0xc4   : > { %2210 = vmatprep.subr.msk.bf16.mxu0 %vm2209_vm9, %v2587_v27  ;;  %vm2211_vm4 = vmpackc.low %vm4436_vm10, %vm4435_vm15  ;;  %vm4441_vm15 = vcmp.eq.s32.totalorder %v2949_v30, %v2895_v25  ;;  %vm4442_vm10 = vcmp.eq.s32.totalorder %v2952_v31, %v2895_v25 }
  0xc5   : > { %2212 = vmatpush1.bf16.msk.msra.mxu0 %vm2211_vm4, %v2587_v27  ;;  %vm2149_vm11 = vmpackc.low %vm4438_vm13, %vm4437_vm0  ;;  %vm4443_vm0 = vcmp.eq.s32.totalorder %v2949_v30, %v2893_v24  ;;  %vm4444_vm13 = vcmp.eq.s32.totalorder %v2952_v31, %v2893_v24 }
  0xc6   : > { %2150 = vmatprep.subr.msk.bf16.mxu1 %vm2149_vm11, %v2587_v27  ;;  %vm2151_vm9 = vmpackc.low %vm4440_vm12, %vm4439_vm1  ;;  %vm4445_vm1 = vcmp.eq.s32.totalorder %v2978_v33, %v2891_v23  ;;  %vm4446_vm12 = vcmp.eq.s32.totalorder %v2981_v34, %v2891_v23 }
  0xc7   : > { %2152 = vmatpush1.bf16.msk.msra.mxu1 %vm2151_vm9, %v2587_v27  ;;  %vm2213_vm4 = vmpackc.low %vm4442_vm10, %vm4441_vm15  ;;  %vm4447_vm15 = vcmp.eq.s32.totalorder %v2978_v33, %v2889_v22  ;;  %vm4448_vm10 = vcmp.eq.s32.totalorder %v2981_v34, %v2889_v22 }
  0xc8   : > { %2214 = vmatprep.subr.msk.bf16.mxu0 %vm2213_vm4, %v2587_v27  ;;  %vm2215_vm11 = vmpackc.low %vm4444_vm13, %vm4443_vm0  ;;  %vm4449_vm0 = vcmp.eq.s32.totalorder %v2978_v33, %v2895_v25  ;;  %vm4450_vm13 = vcmp.eq.s32.totalorder %v2981_v34, %v2895_v25 }
  0xc9   : > { %2216 = vmatpush1.bf16.msk.msra.mxu0 %vm2215_vm11, %v2587_v27  ;;  %vm2153_vm9 = vmpackc.low %vm4446_vm12, %vm4445_vm1  ;;  %vm4451_vm1 = vcmp.eq.s32.totalorder %v2978_v33, %v2893_v24  ;;  %vm4452_vm12 = vcmp.eq.s32.totalorder %v2981_v34, %v2893_v24 }
  0xca   : > { %2154 = vmatprep.subr.msk.bf16.mxu1 %vm2153_vm9, %v2587_v27  ;;  %vm2155_vm4 = vmpackc.low %vm4448_vm10, %vm4447_vm15  ;;  %vm4453_vm15 = vcmp.eq.s32.totalorder %v3004_v35, %v2891_v23  ;;  %vm4454_vm10 = vcmp.eq.s32.totalorder %v3007_v36, %v2891_v23 }
  0xcb   : > { %2156 = vmatpush1.bf16.msk.msra.mxu1 %vm2155_vm4, %v2587_v27  ;;  %vm2217_vm11 = vmpackc.low %vm4450_vm13, %vm4449_vm0  ;;  %vm4455_vm0 = vcmp.eq.s32.totalorder %v3004_v35, %v2889_v22  ;;  %vm4456_vm13 = vcmp.eq.s32.totalorder %v3007_v36, %v2889_v22 }
  0xcc   : > { %2218 = vmatprep.subr.msk.bf16.mxu0 %vm2217_vm11, %v2587_v27  ;;  %vm2219_vm9 = vmpackc.low %vm4452_vm12, %vm4451_vm1  ;;  %vm4457_vm1 = vcmp.eq.s32.totalorder %v3004_v35, %v2895_v25  ;;  %vm4458_vm12 = vcmp.eq.s32.totalorder %v3007_v36, %v2895_v25 }
  0xcd   : > { %2220 = vmatpush1.bf16.msk.msra.mxu0 %vm2219_vm9, %v2587_v27  ;;  %vm2157_vm4 = vmpackc.low %vm4454_vm10, %vm4453_vm15  ;;  %vm4459_vm15 = vcmp.eq.s32.totalorder %v3004_v35, %v2893_v24  ;;  %vm4460_vm10 = vcmp.eq.s32.totalorder %v3007_v36, %v2893_v24 }
  0xce   : > { %2158 = vmatprep.subr.msk.bf16.mxu1 %vm2157_vm4, %v2587_v27  ;;  %vm2159_vm11 = vmpackc.low %vm4456_vm13, %vm4455_vm0  ;;  %vm4461_vm0 = vcmp.eq.s32.totalorder %v3030_v37, %v2891_v23  ;;  %vm4462_vm13 = vcmp.eq.s32.totalorder %v3033_v38, %v2891_v23 }
  0xcf   : > { %2160 = vmatpush1.bf16.msk.msra.mxu1 %vm2159_vm11, %v2587_v27  ;;  %vm2221_vm9 = vmpackc.low %vm4458_vm12, %vm4457_vm1  ;;  %vm4463_vm1 = vcmp.eq.s32.totalorder %v3030_v37, %v2889_v22  ;;  %vm4464_vm12 = vcmp.eq.s32.totalorder %v3033_v38, %v2889_v22 }
  0xd0   : > { %2222 = vmatprep.subr.msk.bf16.mxu0 %vm2221_vm9, %v2587_v27  ;;  %vm2223_vm4 = vmpackc.low %vm4460_vm10, %vm4459_vm15  ;;  %vm4465_vm15 = vcmp.eq.s32.totalorder %v3030_v37, %v2895_v25  ;;  %vm4466_vm10 = vcmp.eq.s32.totalorder %v3033_v38, %v2895_v25 }
  0xd1   : > { %2224 = vmatpush1.bf16.msk.msra.mxu0 %vm2223_vm4, %v2587_v27  ;;  %vm2161_vm11 = vmpackc.low %vm4462_vm13, %vm4461_vm0  ;;  %vm4467_vm0 = vcmp.eq.s32.totalorder %v3030_v37, %v2893_v24  ;;  %vm4468_vm13 = vcmp.eq.s32.totalorder %v3033_v38, %v2893_v24 }
  0xd2   : > { %2162 = vmatprep.subr.msk.bf16.mxu1 %vm2161_vm11, %v2587_v27  ;;  %vm2163_vm9 = vmpackc.low %vm4464_vm12, %vm4463_vm1  ;;  %vm4469_vm1 = vcmp.eq.s32.totalorder %v3051_v39, %v2891_v23  ;;  %vm4470_vm12 = vcmp.eq.s32.totalorder %v3059_v40, %v2891_v23 }
  0xd3   : > { %2164 = vmatpush1.bf16.msk.msra.mxu1 %vm2163_vm9, %v2587_v27  ;;  %vm2225_vm4 = vmpackc.low %vm4466_vm10, %vm4465_vm15  ;;  %vm4471_vm15 = vcmp.eq.s32.totalorder %v3051_v39, %v2889_v22  ;;  %vm4472_vm10 = vcmp.eq.s32.totalorder %v3059_v40, %v2889_v22 }
  0xd4   : > { %2226 = vmatprep.subr.msk.bf16.mxu0 %vm2225_vm4, %v2587_v27  ;;  %vm2227_vm11 = vmpackc.low %vm4468_vm13, %vm4467_vm0  ;;  %vm4473_vm0 = vcmp.eq.s32.totalorder %v3051_v39, %v2895_v25  ;;  %vm4474_vm13 = vcmp.eq.s32.totalorder %v3059_v40, %v2895_v25 }
  0xd5   : > { %2228 = vmatpush1.bf16.msk.msra.mxu0 %vm2227_vm11, %v2587_v27  ;;  %vm2165_vm9 = vmpackc.low %vm4470_vm12, %vm4469_vm1  ;;  %vm4475_vm1 = vcmp.eq.s32.totalorder %v3051_v39, %v2893_v24  ;;  %vm4476_vm12 = vcmp.eq.s32.totalorder %v3059_v40, %v2893_v24 }
  0xd6   : > { %2166 = vmatprep.subr.msk.bf16.mxu1 %vm2165_vm9, %v2587_v27  ;;  %vm2167_vm4 = vmpackc.low %vm4472_vm10, %vm4471_vm15  ;;  %vm4477_vm15 = vcmp.eq.s32.totalorder %v3067_v41, %v2891_v23  ;;  %vm4478_vm10 = vcmp.eq.s32.totalorder %v3070_v42, %v2891_v23 }
  0xd7   : > { %2168 = vmatpush1.bf16.msk.msra.mxu1 %vm2167_vm4, %v2587_v27  ;;  %vm2229_vm11 = vmpackc.low %vm4474_vm13, %vm4473_vm0  ;;  %vm4479_vm0 = vcmp.eq.s32.totalorder %v3067_v41, %v2889_v22 }
  0xd8   : > { %2230 = vmatprep.subr.msk.bf16.mxu0 %vm2229_vm11, %v2587_v27  ;;  %vm2231_vm9 = vmpackc.low %vm4476_vm12, %vm4475_vm1  ;;  %vm4480_vm11 = vcmp.eq.s32.totalorder %v3067_v41, %v2895_v25  ;;  %vm4481_vm1 = vcmp.eq.s32.totalorder %v3070_v42, %v2895_v25 }
  0xd9   : > { %2232 = vmatpush1.bf16.msk.msra.mxu0 %vm2231_vm9, %v2587_v27  ;;  %vm2169_vm4 = vmpackc.low %vm4478_vm10, %vm4477_vm15  ;;  %vm4482_vm9 = vcmp.eq.s32.totalorder %v3067_v41, %v2893_v24  ;;  %vm4484_vm10 = vcmp.eq.s32.totalorder %v3129_v44, %v2891_v23 }
  0xda   : > { %2170 = vmatprep.subr.msk.bf16.mxu1 %vm2169_vm4, %v2587_v27  ;;  %vm2171_vm13 = vmpackc.low %vm642_vm7, %vm4479_vm0  ;;  %vm4483_vm7 = vcmp.eq.s32.totalorder %v3113_v43, %v2891_v23  ;;  %vm4485_vm0 = vcmp.eq.s32.totalorder %v3113_v43, %v2889_v22 }
  0xdb   : > { %2172 = vmatpush1.bf16.msk.msra.mxu1 %vm2171_vm13, %v2587_v27  ;;  %vm2233_vm12 = vmpackc.low %vm4481_vm1, %vm4480_vm11  ;;  %vm4487_vm1 = vcmp.eq.s32.totalorder %v3113_v43, %v2893_v24 }
  0xdc   : > { %2234 = vmatprep.subr.msk.bf16.mxu0 %vm2233_vm12, %v2587_v27  ;;  %vm2235_vm15 = vmpackc.low %vm644_vm2, %vm4482_vm9  ;;  %vm4486_vm2 = vcmp.eq.s32.totalorder %v3129_v44, %v2895_v25  ;;  %vm4488_vm12 = vcmp.eq.s32.totalorder %v3129_v44, %v2893_v24 }
  0xdd   : > { %2236 = vmatpush1.bf16.msk.msra.mxu0 %vm2235_vm15, %v2587_v27  ;;  %vm2173_vm4 = vmpackc.low %vm4484_vm10, %vm4483_vm7  ;;  %vm4490_vm15 = vcmp.eq.s32.totalorder %v3146_v46, %v2891_v23  ;;  %vm4492_vm10 = vcmp.eq.s32.totalorder %v3146_v46, %v2889_v22 }
  0xde   : > { %2174 = vmatprep.subr.msk.bf16.mxu1 %vm2173_vm4, %v2587_v27  ;;  %vm2175_vm13 = vmpackc.low %vm658_vm14, %vm4485_vm0  ;;  %vm4489_vm14 = vcmp.eq.s32.totalorder %v3143_v45, %v2891_v23  ;;  %vm4493_vm0 = vcmp.eq.s32.totalorder %v3143_v45, %v2895_v25 }
  0xdf   : > { %2176 = vmatpush1.bf16.msk.msra.mxu1 %vm2175_vm13, %v2587_v27  ;;  %vm2237_vm11 = vmpackc.low %vm4486_vm2, %vm653_vm5  ;;  %vm4491_vm5 = vcmp.eq.s32.totalorder %v3143_v45, %v2889_v22  ;;  %vm4494_vm13 = vcmp.eq.s32.totalorder %v3146_v46, %v2895_v25 }
  0xe0   : > { %2238 = vmatprep.subr.msk.bf16.mxu0 %vm2237_vm11, %v2587_v27  ;;  %vm2239_vm9 = vmpackc.low %vm4488_vm12, %vm4487_vm1  ;;  %vm4495_vm11 = vcmp.eq.s32.totalorder %v3143_v45, %v2893_v24  ;;  %vm4496_vm1 = vcmp.eq.s32.totalorder %v3146_v46, %v2893_v24 }
  0xe1   : > { %2240 = vmatpush1.bf16.msk.msra.mxu0 %vm2239_vm9, %v2587_v27  ;;  %vm2177_vm7 = vmpackc.low %vm4490_vm15, %vm4489_vm14  ;;  %vm4497_vm9 = vcmp.eq.s32.totalorder %v3190_v47, %v2891_v23  ;;  %vm4498_vm14 = vcmp.eq.s32.totalorder %v3193_v48, %v2891_v23 }
  0xe2   : > { %2178 = vmatprep.subr.msk.bf16.mxu1 %vm2177_vm7, %v2587_v27  ;;  %vm2179_vm4 = vmpackc.low %vm4492_vm10, %vm4491_vm5  ;;  %vm4499_vm7 = vcmp.eq.s32.totalorder %v3190_v47, %v2889_v22  ;;  %vm4500_vm10 = vcmp.eq.s32.totalorder %v3190_v47, %v2895_v25 }
  0xe3   : > { %2180 = vmatpush1.bf16.msk.msra.mxu1 %vm2179_vm4, %v2587_v27  ;;  %vm2241_vm2 = vmpackc.low %vm4494_vm13, %vm4493_vm0  ;;  %vm4501_vm4 = vcmp.eq.s32.totalorder %v3193_v48, %v2895_v25  ;;  %vm4502_vm13 = vcmp.eq.s32.totalorder %v3190_v47, %v2893_v24 }
  0xe4   : > { %2242 = vmatprep.subr.msk.bf16.mxu0 %vm2241_vm2, %v2587_v27  ;;  %vm2243_vm12 = vmpackc.low %vm4496_vm1, %vm4495_vm11  ;;  %vm4504_vm11 = vcmp.eq.s32.totalorder %v3242_v52, %v2891_v23 }
  0xe5   : > { %2244 = vmatpush1.bf16.msk.msra.mxu0 %vm2243_vm12, %v2587_v27  ;;  %vm2181_vm15 = vmpackc.low %vm4498_vm14, %vm4497_vm9  ;;  %vm4505_vm12 = vcmp.eq.s32.totalorder %v3239_v51, %v2889_v22  ;;  %vm4507_vm14 = vcmp.eq.s32.totalorder %v3242_v52, %v2895_v25 }
  0xe6   : > { %2182 = vmatprep.subr.msk.bf16.mxu1 %vm2181_vm15, %v2587_v27  ;;  %vm2183_vm5 = vmpackc.low %vm690_vm3, %vm4499_vm7  ;;  %vm4503_vm3 = vcmp.eq.s32.totalorder %v3239_v51, %v2891_v23  ;;  %vm4508_vm7 = vcmp.eq.s32.totalorder %v3239_v51, %v2893_v24 }
  0xe7   : > { %2184 = vmatpush1.bf16.msk.msra.mxu1 %vm2183_vm5, %v2587_v27  ;;  %vm2245_vm0 = vmpackc.low %vm4501_vm4, %vm4500_vm10  ;;  %vm4509_vm5 = vcmp.eq.s32.totalorder %v3242_v52, %v2893_v24  ;;  %vm4511_vm4 = vcmp.eq.s32.totalorder %v3291_v57, %v2891_v23 }
  0xe8   : > { %2246 = vmatprep.subr.msk.bf16.mxu0 %vm2245_vm0, %v2587_v27  ;;  %vm2247_vm2 = vmpackc.low %vm692_vm6, %vm4502_vm13  ;;  %vm4506_vm6 = vcmp.eq.s32.totalorder %v3239_v51, %v2895_v25  ;;  %vm4512_vm13 = vcmp.eq.s32.totalorder %v3260_v55, %v2889_v22 }
  0xe9   : > { %2248 = vmatpush1.bf16.msk.msra.mxu0 %vm2247_vm2, %v2587_v27  ;;  %vm2185_vm1 = vmpackc.low %vm4504_vm11, %vm4503_vm3  ;;  %vm4513_vm2 = vcmp.eq.s32.totalorder %v3291_v57, %v2889_v22  ;;  %vm4514_vm11 = vcmp.eq.s32.totalorder %v3260_v55, %v2895_v25 }
  0xea   : > { %2186 = vmatprep.subr.msk.bf16.mxu1 %vm2185_vm1, %v2587_v27  ;;  %vm2187_vm9 = vmpackc.low %vm706_vm8, %vm4505_vm12  ;;  %vm4510_vm8 = vcmp.eq.s32.totalorder %v3260_v55, %v2891_v23  ;;  %vm4515_vm1 = vcmp.eq.s32.totalorder %v3291_v57, %v2895_v25 }
  0xeb   : > { %2188 = vmatpush1.bf16.msk.msra.mxu1 %vm2187_vm9, %v2587_v27  ;;  %vm2249_vm15 = vmpackc.low %vm4507_vm14, %vm4506_vm6  ;;  %vm4516_vm9 = vcmp.eq.s32.totalorder %v3260_v55, %v2893_v24  ;;  %vm4517_vm6 = vcmp.eq.s32.totalorder %v3291_v57, %v2893_v24 }
  0xec   : > { %2250 = vmatprep.subr.msk.bf16.mxu0 %vm2249_vm15, %v2587_v27  ;;  %vm2251_vm10 = vmpackc.low %vm4509_vm5, %vm4508_vm7  ;;  %vm4518_vm15 = vcmp.eq.s32.totalorder %v3294_v58, %v2891_v23  ;;  %vm4519_vm7 = vcmp.eq.s32.totalorder %v3297_v59, %v2891_v23 }
  0xed   : > { %2252 = vmatpush1.bf16.msk.msra.mxu0 %vm2251_vm10, %v2587_v27  ;;  %vm2189_vm0 = vmpackc.low %vm4511_vm4, %vm4510_vm8  ;;  %vm4520_vm10 = vcmp.eq.s32.totalorder %v3294_v58, %v2889_v22  ;;  %vm4521_vm8 = vcmp.eq.s32.totalorder %v3297_v59, %v2889_v22 }
  0xee   : > { %2190 = vmatprep.subr.msk.bf16.mxu1 %vm2189_vm0, %v2587_v27  ;;  %vm2191_vm3 = vmpackc.low %vm4513_vm2, %vm4512_vm13  ;;  %vm4522_vm0 = vcmp.eq.s32.totalorder %v3294_v58, %v2895_v25  ;;  %vm4523_vm13 = vcmp.eq.s32.totalorder %v3297_v59, %v2895_v25 }
  0xef   : > { %2192 = vmatpush1.bf16.msk.msra.mxu1 %vm2191_vm3, %v2587_v27  ;;  %vm2253_vm12 = vmpackc.low %vm4515_vm1, %vm4514_vm11  ;;  %vm4524_vm3 = vcmp.eq.s32.totalorder %v3294_v58, %v2893_v24  ;;  %vm4525_vm11 = vcmp.eq.s32.totalorder %v3297_v59, %v2893_v24 }
  0xf0   : > { %2254 = vmatprep.subr.msk.bf16.mxu0 %vm2253_vm12, %v2587_v27  ;;  %vm2255_vm14 = vmpackc.low %vm4517_vm6, %vm4516_vm9  ;;  %vm4526_vm12 = vcmp.eq.s32.totalorder %v3313_v61, %v2891_v23  ;;  %vm4527_vm9 = vcmp.eq.s32.totalorder %v3334_v62, %v2891_v23  ;;  %v342_v15 = vpop.permute.xlu0 %341 }
  0xf1   : > { %2256 = vmatpush1.bf16.msk.msra.mxu0 %vm2255_vm14, %v2587_v27  ;;  %vm2193_vm5 = vmpackc.low %vm4519_vm7, %vm4518_vm15  ;;  %vm4528_vm14 = vcmp.eq.s32.totalorder %v3313_v61, %v2889_v22  ;;  %vm4529_vm15 = vcmp.eq.s32.totalorder %v3334_v62, %v2889_v22 }
  0xf2   : > { %2194 = vmatprep.subr.msk.bf16.mxu1 %vm2193_vm5, %v2587_v27  ;;  %vm2195_vm4 = vmpackc.low %vm4521_vm8, %vm4520_vm10  ;;  %vm4530_vm5 = vcmp.eq.s32.totalorder %v3313_v61, %v2895_v25  ;;  %vm4531_vm10 = vcmp.eq.s32.totalorder %v3334_v62, %v2895_v25 }
  0xf3   : > { %2196 = vmatpush1.bf16.msk.msra.mxu1 %vm2195_vm4, %v2587_v27  ;;  %vm2257_vm2 = vmpackc.low %vm4523_vm13, %vm4522_vm0  ;;  %vm4532_vm4 = vcmp.eq.s32.totalorder %v3313_v61, %v2893_v24  ;;  %vm4533_vm0 = vcmp.eq.s32.totalorder %v3334_v62, %v2893_v24 }
  0xf4   : > { %2258 = vmatprep.subr.msk.bf16.mxu0 %vm2257_vm2, %v2587_v27  ;;  %vm2259_vm1 = vmpackc.low %vm4525_vm11, %vm4524_vm3  ;;  %v347_v29 = vpop.permute.xlu0 %346 }
  0xf5   : > { %2260 = vmatpush1.bf16.msk.msra.mxu0 %vm2259_vm1, %v2587_v27  ;;  %vm2197_vm6 = vmpackc.low %vm4527_vm9, %vm4526_vm12 }
  0xf6   : > { %2198 = vmatprep.subr.msk.bf16.mxu1 %vm2197_vm6, %v2587_v27  ;;  %vm2199_vm7 = vmpackc.low %vm4529_vm15, %vm4528_vm14 }
  0xf7   : > { %2200 = vmatpush1.bf16.msk.msra.mxu1 %vm2199_vm7, %v2587_v27  ;;  %vm2261_vm8 = vmpackc.low %vm4531_vm10, %vm4530_vm5 }
  0xf8   : > { %2262 = vmatprep.subr.msk.bf16.mxu0 %vm2261_vm8, %v2587_v27  ;;  %vm2263_vm13 = vmpackc.low %vm4533_vm0, %vm4532_vm4 }
  0xf9   : > { %2264 = vmatpush1.bf16.msk.msra.mxu0 %vm2263_vm13, %v2587_v27 }
  0xfa   : > { %1517 = vmatmul.mubr.bf16.vlgmr.msra.gmra.mrb[4].mxu1 %v3299_v60 }
  0xfc   : > { %1560 = vmatmul.mubr.bf16.vlgmr.msra.gmra.mrb[8].mxu0 %v3299_v60 }
 0x144   : > { %v2278_v63 = vpop.f32.mrb[0].mxu0 }
 0x145   : > { %v426_v0 = vpop.f32.mrb[1].mxu0  ;;  %v432_v33 = vadd.f32 %v2278_v63, %v347_v29 }
 0x146   : > { %v427_v30 = vadd.f32 %v426_v0, %v342_v15 }
 0x18d   : > { %v1432_v1 = vpop.f32.mrb[0].mxu1 }
 0x18e   : > { %v1434_v2 = vpop.f32.mrb[1].mxu1 }
 0x18f   : > { %v1570_v3 = vmax.f32 %v1432_v1, %v1434_v2  ;;  %v1436_v4 = vpop.f32.mrb[2].mxu1  ;;  %v1475_v5 = vpop.f32.mrb[4].mxu0 }
 0x190   : > { %v1438_v6 = vpop.f32.mrb[3].mxu1  ;;  %v1477_v7 = vpop.f32.mrb[5].mxu0 }
 0x191   : > { %v1572_v8 = vmax.f32 %v1570_v3, %v1475_v5  ;;  %v1571_v9 = vmax.f32 %v1436_v4, %v1438_v6  ;;  %v1479_v10 = vpop.f32.mrb[6].mxu0 }
 0x192   : > { %v1481_v11 = vpop.f32.mrb[7].mxu0 }
 0x193   : > { %v1574_v12 = vmax.f32 %v1572_v8, %v1477_v7  ;;  %v1573_v13 = vmax.f32 %v1571_v9, %v1479_v10 }
 0x195   : > { %v1575_v14 = vmax.f32 %v1573_v13, %v1481_v11 }
 0x1cd   : > { %v1518_v16 = vpop.f32.mrb[4].mxu1 }
 0x1ce   : > { %v1576_v17 = vmax.f32 %v1574_v12, %v1518_v16  ;;  %v1520_v18 = vpop.f32.mrb[5].mxu1 }
 0x1cf   : > { %v1561_v19 = vpop.f32.mrb[8].mxu0  ;;  %v1522_v20 = vpop.f32.mrb[6].mxu1 }
 0x1d0   : > { %v1578_v21 = vmax.f32 %v1576_v17, %v1520_v18  ;;  %v1577_v22 = vmax.f32 %v1575_v14, %v1522_v20  ;;  %v1563_v23 = vpop.f32.mrb[9].mxu0  ;;  %v1524_v24 = vpop.f32.mrb[7].mxu1 }
 0x1d1   : > { %v1565_v25 = vpop.f32.mrb[10].mxu0 }
 0x1d2   : > { %v1580_v26 = vmax.f32 %v1578_v21, %v1561_v19  ;;  %v1579_v27 = vmax.f32 %v1577_v22, %v1524_v24  ;;  %v1567_v28 = vpop.f32.mrb[11].mxu0 }
 0x1d4   : > { %v1582_v31 = vmax.f32 %v1580_v26, %v1563_v23  ;;  %v1581_v32 = vmax.f32 %v1579_v27, %v1565_v25 }
 0x1d6   : > { %v1584_v34 = vadd.f32 %v1582_v31, %v427_v30  ;;  %v1583_v35 = vmax.f32 %v1581_v32, %v1567_v28 }
 0x1d8   : > { %v1586_v36 = vmax.f32 %v1584_v34, 0.0  ;;  %v1585_v37 = vadd.f32 %v1583_v35, %v432_v33 }
 0x1da   : > { %1588 = vst [vmem:[%s320_s18] sm:$0xff] %v1586_v36  ;;  %v1587_v38 = vmax.f32 %v1585_v37, 0.0 }
 0x1dc   : > { %1589 = vst [vmem:[%s320_s18 + $0x8] sm:$0xff] %v1587_v38 }
 0x1dd   : > { %2467 = shalt.err (!%p2464_p1)
}
 0x1de   : > { %s2468_s11 = scalar_lea.hbm %s4279_s6, 256  ;;  %s2472_s18 = scalar_lea.hbm %s4535_s13, 1024 }
 0x1df   : > { %p2469_p9 = scmp.ne.s32.totalorder %s4279_s6, %s2468_s11  ;;  %p2473_p2 = scmp.lt.u32.totalorder %s4279_s6, %s4535_s13 }
 0x1e0   : > { %p2474_p4 = scmp.lt.u32.totalorder %s2472_s18, %s2468_s11  ;;  %p2476_p7 = scmp.lt.u32.totalorder %s2468_s11, %s4279_s6 }
 0x1e1   : > { %p2470_p13 = pnand %p2469_p9, %p4536_p3 }
 0x1e2   : > { %p2475_p8 = por %p2474_p4, %p2473_p2 }
 0x1e3   : > { %p2471_p10 = pneg %p2470_p13 }
 0x1e4   : > { %p2477_p6 = por %p2476_p7, %p2475_p8 }
 0x1e6   : > { %p2478_p12 = pnand %p2477_p6, %p2471_p10 }
 0x1e8   : > { %2481 = shalt.err (!%p2478_p12)
}
 0x1e9   : > { %s2589_s24 = smov 128   ;;  %s2590_s21 = smov 256  }
 0x1ea   : > { %s2591_s12 = smov 8  }
 0x1eb   : > { %2283 = dma.vmem_to_hbm [thread:$0]  (%p4536_p3), %s4274_s5, 256, %s4279_s6, %s1591_s9, %s2589_s24, %s2590_s21, %s2591_s12  }
 0x1ec PF: > { %s4537_s8 = sld [smem:[#allocation11_spill]]  ;;  %p2297_p0 = scmp.ge.s32.totalorder %s2580_s28, 2 }
 0x1ed   : > { %p4538_p5 = scmp.ne.s32.totalorder %s4371_s15, 0 }
 0x1ef   : > { %p2293_p11 = pnand %p2297_p0, %p4538_p5 }
 0x1f2   : > { %s1620_s0 = sand.u32 1, %s4537_s8  }
 0x1f3   : > { %s1621_s11 = scalar_lea.sflag [#allocation4], %s1620_s0 }
 0x1f4   : > { %2535 = dma.done.wait (!%p2293_p11), %s1621_s11, 256  }
 0x1f5   : > { %2537 = vsyncadd (!%p2293_p11), %s1621_s11, 4294967040  ;;  %s24_s28 = sadd.s32 1, %s2580_s28   ;;  %s4539_s29 = sld [smem:[#allocation12_spill]] }
 0x1f6   : > { %p21_p1 = scmp.ge.s32.totalorder %s24_s28, 6   ;;  %s4540_s30 = sld [smem:[#allocation13_spill]] }
 0x1f7   : > { %s4541_s18 = smov %s2544_s19  ;;  %s4542_s19 = smov %s2548_s20 }
 0x1f8   : > { %s4543_s20 = smov %s2780_s7  ;;  %s4544_s21 = smov %s2556_s22 }
 0x1f9   : > { %s4545_s22 = smov %s2560_s23  ;;  %s4546_s23 = smov %s2777_s17 }
 0x1fa   : > { %s4547_s24 = smov %s2572_s26  ;;  %s4548_s25 = smov %s2576_s27 }
 0x1fb   : > { %s4549_s26 = smov %s4539_s29  ;;  %23 = sbr.rel (!%p21_p1) target bundleno = 14 (0xe), region = 101 }
 0x1fc   : > { %s4550_s27 = smov %s4540_s30 }
 0x202   :  { %1626 = vsyncpa [#allocation3], 1 }
 0x203   :  { %1628 = vsyncpa [#allocation3 + $0x1], 1 }
 0x204   :  { %1629 = vsyncpa [#allocation6], 1 }
 0x205   :  { %1631 = vsyncpa [#allocation6 + $0x1], 1 }
 0x206   :  { %1632 = vsyncpa [#allocation4], 1 }
 0x207   :  { %1634 = vsyncpa [#allocation4 + $0x1], 1 }

</bundles_post_ra>
